<compile_context>
chip_gen: v7x
topology: tpu7x:2x2x1
jax: 0.10.0
libtpu: 0.0.40
codegen_flags: <defaults>
</compile_context>

<pallas_src>
import jax
import jax.numpy as jnp
from jax import lax
from jax.experimental import pallas as pl
from jax.experimental.pallas import tpu as pltpu

KSIZE = 5
PAD = 2
EPS = 1e-5

TH = 16          # output rows per band (grid step)


def _round_up(x, m):
    return (x + m - 1) // m * m


def _aligned(v):
    return v if isinstance(v, int) else pl.multiple_of(v, 128)


# ---------------------------------------------------------------------------
# Pallas kernel: banded 5x5 conv (stride 1) + folded BN bias, flat-spatial,
# kw folded into the contraction (K = 5*Cp), manually double-buffered band DMA.
# ---------------------------------------------------------------------------
def _make_conv_bn_kernel(Cp, Cout, WB, NBI, MW):
    BAND = (TH + 5) * WB          # rows DMA'd per band (TH + 4 halo + 1 slop)
    LEN = (TH + 4) * WB           # pre-shifted scratch length
    M = TH * WB                   # flat output positions per band
    KC = KSIZE * Cp
    n_chunks = M // MW

    def kernel(x_hbm, w_ref, b_ref, out_ref, band_buf, shifted_ref, sem):
        n = pl.program_id(0)
        g = pl.program_id(1)
        hb = pl.program_id(2)
        slot = hb % 2
        band0 = g * NBI                       # first band index of this group

        def band_copy(b_idx, s):
            start = pl.multiple_of(b_idx * M, 128)
            return pltpu.make_async_copy(
                x_hbm.at[n, :, pl.ds(start, BAND)],   # (Cp, BAND) slice in HBM
                band_buf.at[s],
                sem.at[s])

        @pl.when(hb == 0)                     # prime first band of this group
        def _():
            band_copy(band0, 0).start()

        band_copy(band0 + hb, slot).wait()    # current band is ready

        @pl.when(hb + 1 < NBI)                # prefetch next band in the group
        def _():
            band_copy(band0 + hb + 1, 1 - slot).start()

        band = band_buf.at[slot]              # (Cp, BAND) bf16 view

        # Pre-shift once per band: shifted[kw*Cp + c, p] = band[c, p + kw].
        for kw in range(KSIZE):
            shifted_ref[kw * Cp:(kw + 1) * Cp, :] = band[:, kw:kw + LEN]

        bias = b_ref[...]                     # (Cout, 1) f32

        def do_chunk(j):
            jm = _aligned(j * MW)
            acc = jnp.zeros((Cout, MW), jnp.float32)
            for kh in range(KSIZE):           # 5 dots, K = 5*Cp each
                off = _aligned(kh * WB + j * MW)
                acc = acc + jnp.dot(w_ref[kh], shifted_ref[:, pl.ds(off, MW)],
                                    preferred_element_type=jnp.float32)
            out_ref[0, :, pl.ds(jm, MW)] = (acc + bias).astype(out_ref.dtype)

        if n_chunks <= 8:                     # short: unroll for LLO visibility
            for j in range(n_chunks):
                do_chunk(j)
        else:                                 # long: bound live ranges
            @pl.loop(0, n_chunks)
            def _(j):
                do_chunk(j)

    return kernel


def segnet_up1_conv_bn(xpad_flat, w_packed, bias_fold, Ho_c, WB, MW):
    N, Cp, _ = xpad_flat.shape
    Cout = w_packed.shape[1]
    KC = KSIZE * Cp
    BAND = (TH + 5) * WB
    LEN = (TH + 4) * WB
    M = TH * WB
    NB = Ho_c // TH
    NG = 2 if (NB % 2 == 0 and NB >= 2) else 1   # give v7x's 2nd core band groups
    NBI = NB // NG

    return pl.pallas_call(
        _make_conv_bn_kernel(Cp, Cout, WB, NBI, MW),
        out_shape=jax.ShapeDtypeStruct((N, Cout, Ho_c * WB), jnp.bfloat16),
        grid_spec=pltpu.PrefetchScalarGridSpec(
            num_scalar_prefetch=0,
            grid=(N, NG, NBI),
            in_specs=[
                pl.BlockSpec(memory_space=pl.ANY),                  # input stays in HBM
                pl.BlockSpec((KSIZE, Cout, KC), lambda n, g, h: (0, 0, 0)),
                pl.BlockSpec((Cout, 1), lambda n, g, h: (0, 0)),
            ],
            out_specs=pl.BlockSpec((1, Cout, M),
                                   lambda n, g, h: (n, 0, g * NBI + h)),
            scratch_shapes=[
                pltpu.VMEM((2, Cp, BAND), jnp.bfloat16),            # dbl-buffered band
                pltpu.VMEM((KC, LEN), jnp.bfloat16),                # pre-shifted taps
                pltpu.SemaphoreType.DMA((2,)),
            ]),
        compiler_params=pltpu.CompilerParams(
            dimension_semantics=("parallel", "parallel", "arbitrary"),
            vmem_limit_bytes=32 * 1024 * 1024),
    )(xpad_flat, w_packed, bias_fold)


# ---------------------------------------------------------------------------
# Forward pass: scatter-free unpool + pad (wrapper), then the Pallas conv+BN.
# ---------------------------------------------------------------------------
def segnet_up1_forward(params, inputs_nchw, indices_nchw, output_shape):
    N, Cin, H, W = inputs_nchw.shape
    Ho, Wo = int(output_shape[2]), int(output_shape[3])
    Cout = params["weight"].shape[0]

    Cp = _round_up(Cin, 16)                       # channel pad for aligned packed-K
    WB = max(128, _round_up(Wo + 2 * PAD, 128))   # lane-aligned padded width
    Ho_c = _round_up(Ho, TH)                      # band-aligned height
    Hp = Ho_c + 5                                 # 2 top pad + >=3 bottom pad/slop
    MW = 512 if Cout <= 32 else 256               # bound f32 accumulator vregs
    assert WB % 128 == 0 and (TH * WB) % MW == 0

    # 1) MaxUnpool2d(2,2) as 4 dense masked interleaves (no TPU scatter).
    #    Assumes PyTorch MaxPool2d windowed indices (winner inside its 2x2 block).
    idx = indices_nchw.astype(jnp.int32)
    dh = (idx // Wo) % 2
    dw = idx % 2
    xb = inputs_nchw.astype(jnp.bfloat16)
    sel_h = (dh[..., None] == jnp.arange(2, dtype=jnp.int32)).astype(xb.dtype)
    sel_w = (dw[..., None] == jnp.arange(2, dtype=jnp.int32)).astype(xb.dtype)
    up = xb[..., None, None] * sel_h[..., :, None] * sel_w[..., None, :]   # (N,C,H,W,2,2)
    up = jnp.transpose(up, (0, 1, 2, 4, 3, 5)).reshape(N, Cin, Ho, Wo)

    # 2) Zero-pad into the lane-aligned conv-input layout (+ channel pad to Cp).
    xpad = jnp.pad(up, ((0, 0), (0, Cp - Cin),
                        (PAD, Hp - Ho - PAD), (PAD, WB - Wo - PAD)))
    xpad = xpad.reshape(N, Cp, Hp * WB)

    # 3) Fold inference BN + conv bias; pack weights as (kh, Cout, 5*Cp)
    #    so row index kw*Cp + c matches the pre-shifted scratch layout.
    scale = params["gamma"] / jnp.sqrt(params["running_var"] + EPS)        # (Cout,)
    w = params["weight"] * scale[:, None, None, None]                      # (Cout,Cin,5,5)
    w = jnp.pad(w, ((0, 0), (0, Cp - Cin), (0, 0), (0, 0)))
    w_packed = jnp.transpose(w, (2, 0, 3, 1)).reshape(KSIZE, Cout, KSIZE * Cp)
    w_packed = w_packed.astype(jnp.bfloat16)
    bias_fold = params["beta"] + (params["bias"] - params["running_mean"]) * scale
    bias_fold = bias_fold.reshape(Cout, 1).astype(jnp.float32)

    out_flat = segnet_up1_conv_bn(xpad, w_packed, bias_fold, Ho_c, WB, MW)
    out = out_flat.reshape(N, Cout, Ho_c, WB)[:, :, :Ho, :Wo].astype(jnp.float32)
    return out


# ---------------------------------------------------------------------------
# Parameters and pure-JAX reference (module semantics, f32)
# ---------------------------------------------------------------------------
def init_params(key, in_size, out_size):
    k = jax.random.split(key, 5)
    weight = 0.1 * jax.random.normal(k[0], (out_size, in_size, KSIZE, KSIZE), jnp.float32)
    bias = 0.1 * jax.random.normal(k[1], (out_size,), jnp.float32)
    gamma = 1.0 + 0.1 * jax.random.normal(k[2], (out_size,), jnp.float32)
    beta = 0.1 * jax.random.normal(k[3], (out_size,), jnp.float32)
    running_mean = 0.1 * jax.random.normal(k[4], (out_size,), jnp.float32)
    running_var = jnp.linspace(0.5, 1.5, out_size).astype(jnp.float32)
    return dict(weight=weight, bias=bias, gamma=gamma, beta=beta,
                running_mean=running_mean, running_var=running_var)


def max_unpool_2x2_ref(x_nchw, indices_nchw, output_shape):
    N, C, H, W = x_nchw.shape
    Ho, Wo = int(output_shape[2]), int(output_shape[3])
    x2 = x_nchw.reshape(N * C, H * W)
    idx2 = indices_nchw.reshape(N * C, H * W).astype(jnp.int32)
    y = jnp.zeros((N * C, Ho * Wo), x_nchw.dtype)
    y = y.at[jnp.arange(N * C)[:, None], idx2].set(x2)
    return y.reshape(N, C, Ho, Wo)


def reference_forward(params, inputs_nchw, indices_nchw, output_shape):
    unpooled = max_unpool_2x2_ref(inputs_nchw, indices_nchw, output_shape)
    conv = lax.conv_general_dilated(
        unpooled, params["weight"], window_strides=(1, 1),
        padding=((PAD, PAD), (PAD, PAD)),
        dimension_numbers=("NCHW", "OIHW", "NCHW"))
    conv = conv + params["bias"][None, :, None, None]
    mean = params["running_mean"][None, :, None, None]
    var = params["running_var"][None, :, None, None]
    gamma = params["gamma"][None, :, None, None]
    beta = params["beta"][None, :, None, None]
    return (conv - mean) / jnp.sqrt(var + EPS) * gamma + beta


if __name__ == "__main__":
    key = jax.random.PRNGKey(0)
    k_x, k_dh, k_dw, k_p = jax.random.split(key, 4)

    N, in_size, out_size = 2, 4, 8
    H = W = 32                       # pooled spatial; output is 64x64
    Ho, Wo = 2 * H, 2 * W
    output_shape = (N, in_size, Ho, Wo)

    x = jax.random.normal(k_x, (N, in_size, H, W), jnp.float32)

    # Valid MaxPool2d(2,2) indices: one winner per non-overlapping 2x2 window,
    # flattened into the (Ho*Wo) plane (PyTorch convention).
    dh = jax.random.randint(k_dh, (N, in_size, H, W), 0, 2)
    dw = jax.random.randint(k_dw, (N, in_size, H, W), 0, 2)
    hh = jnp.arange(H)[None, None, :, None]
    ww = jnp.arange(W)[None, None, None, :]
    indices = ((2 * hh + dh) * Wo + (2 * ww + dw)).astype(jnp.int32)

    params = init_params(k_p, in_size, out_size)

    out = segnet_up1_forward(params, x, indices, output_shape)
    out = jax.block_until_ready(out)

    ref = jax.block_until_ready(reference_forward(params, x, indices, output_shape))
    assert out.shape == (N, out_size, Ho, Wo), out.shape
    # bf16 activations/weights/output (f32 accumulation) vs. the f32 reference.
    assert jnp.allclose(out, ref, rtol=5e-2, atol=5e-2), float(jnp.max(jnp.abs(out - ref)))

    print("KERNEL_OK")
</pallas_src>

<mosaic_0001>
module attributes {stable_mosaic.version = 11 : i64} {
  func.func @kernel(%arg0: i32, %arg1: i32, %arg2: i32, %arg3: memref<2x16x8832xbf16, #tpu.memory_space<any>>, %arg4: memref<5x8x80xbf16, #tpu.memory_space<vmem>>, %arg5: memref<8x1xf32, #tpu.memory_space<vmem>>, %arg6: memref<1x8x2048xbf16, #tpu.memory_space<vmem>>, %arg7: memref<2x16x2688xbf16, #tpu.memory_space<vmem>>, %arg8: memref<80x2560xbf16, #tpu.memory_space<vmem>>, %arg9: memref<2x!tpu.dma_semaphore, #tpu.memory_space<semaphore_mem>>) attributes {dimension_semantics = [#tpu.dimension_semantics<parallel>, #tpu.dimension_semantics<parallel>, #tpu.dimension_semantics<arbitrary>], iteration_bounds = array<i64: 2, 2, 2>, scalar_prefetch = 0 : i64, scratch_operands = 3 : i64, tpu.core_type = #tpu.core_type<tc>, window_params = [{}, {pipeline_mode = #tpu.pipeline_mode<synchronous>, transform_indices = @transform_1, window_bounds = array<i64: 5, 8, 80>}, {pipeline_mode = #tpu.pipeline_mode<synchronous>, transform_indices = @transform_2, window_bounds = array<i64: 8, 1>}, {transform_indices = @transform_3, window_bounds = array<i64: 1, 8, 2048>}]} {
    %c2_i32 = arith.constant 2 : i32
    %c0_i32 = arith.constant 0 : i32
    %0 = arith.cmpi eq, %c2_i32, %c0_i32 : i32
    %c1_i32 = arith.constant 1 : i32
    %1 = arith.select %0, %c1_i32, %c2_i32 : i32
    %2 = arith.remsi %arg2, %1 : i32
    %c0_i32_0 = arith.constant 0 : i32
    %3 = arith.cmpi ne, %2, %c0_i32_0 : i32
    %c0_i32_1 = arith.constant 0 : i32
    %4 = arith.cmpi slt, %2, %c0_i32_1 : i32
    %c0_i32_2 = arith.constant 0 : i32
    %5 = arith.cmpi slt, %1, %c0_i32_2 : i32
    %6 = arith.xori %4, %5 : i1
    %7 = arith.andi %6, %3 : i1
    %8 = arith.addi %2, %1 : i32
    %9 = arith.select %7, %8, %2 : i32
    %c2_i32_3 = arith.constant 2 : i32
    %10 = arith.muli %arg1, %c2_i32_3 : i32
    %c0_i32_4 = arith.constant 0 : i32
    %11 = arith.cmpi eq, %arg2, %c0_i32_4 : i32
    %12 = arith.extui %11 : i1 to i32
    %c0_i32_5 = arith.constant 0 : i32
    %13 = arith.cmpi ne, %12, %c0_i32_5 : i32
    scf.if %13 {
      %c2048_i32_154 = arith.constant 2048 : i32
      %176 = arith.muli %10, %c2048_i32_154 : i32
      %177 = tpu.assume_multiple %176, 128 : i32
      %c0_i32_155 = arith.constant 0 : i32
      %c0_i32_156 = arith.constant 0 : i32
      %c0_i32_157 = arith.constant 0 : i32
      %178 = tpu.memref_slice %arg3[%arg0, %c0_i32_157, %177] : memref<2x16x8832xbf16, #tpu.memory_space<any>> -> memref<1x16x2688xbf16, #tpu.memory_space<any>>
      %179 = tpu.memref_squeeze %178 : memref<1x16x2688xbf16, #tpu.memory_space<any>> -> memref<16x2688xbf16, #tpu.memory_space<any>>
      %c0_i32_158 = arith.constant 0 : i32
      %c0_i32_159 = arith.constant 0 : i32
      %180 = tpu.memref_slice %arg7[%c0_i32_155, %c0_i32_158, %c0_i32_159] : memref<2x16x2688xbf16, #tpu.memory_space<vmem>> -> memref<1x16x2688xbf16, #tpu.memory_space<vmem>>
      %181 = tpu.memref_squeeze %180 : memref<1x16x2688xbf16, #tpu.memory_space<vmem>> -> memref<16x2688xbf16, #tpu.memory_space<vmem>>
      %182 = tpu.memref_slice %arg9[%c0_i32_156] : memref<2x!tpu.dma_semaphore, #tpu.memory_space<semaphore_mem>> -> memref<1x!tpu.dma_semaphore, #tpu.memory_space<semaphore_mem>>
      %183 = tpu.memref_squeeze %182 : memref<1x!tpu.dma_semaphore, #tpu.memory_space<semaphore_mem>> -> memref<!tpu.dma_semaphore, #tpu.memory_space<semaphore_mem>>
      tpu.enqueue_dma source(%179 : memref<16x2688xbf16, #tpu.memory_space<any>>) target(%181 : memref<16x2688xbf16, #tpu.memory_space<vmem>>) target_semaphore(%183 : memref<!tpu.dma_semaphore, #tpu.memory_space<semaphore_mem>>)
    } else {
    }
    %14 = arith.addi %10, %arg2 : i32
    %c2048_i32 = arith.constant 2048 : i32
    %15 = arith.muli %14, %c2048_i32 : i32
    %16 = tpu.assume_multiple %15, 128 : i32
    %c0_i32_6 = arith.constant 0 : i32
    %17 = tpu.memref_slice %arg3[%arg0, %c0_i32_6, %16] : memref<2x16x8832xbf16, #tpu.memory_space<any>> -> memref<1x16x2688xbf16, #tpu.memory_space<any>>
    %18 = tpu.memref_squeeze %17 : memref<1x16x2688xbf16, #tpu.memory_space<any>> -> memref<16x2688xbf16, #tpu.memory_space<any>>
    %c0_i32_7 = arith.constant 0 : i32
    %c0_i32_8 = arith.constant 0 : i32
    %19 = tpu.memref_slice %arg7[%9, %c0_i32_7, %c0_i32_8] : memref<2x16x2688xbf16, #tpu.memory_space<vmem>> -> memref<1x16x2688xbf16, #tpu.memory_space<vmem>>
    %20 = tpu.memref_squeeze %19 : memref<1x16x2688xbf16, #tpu.memory_space<vmem>> -> memref<16x2688xbf16, #tpu.memory_space<vmem>>
    %21 = tpu.memref_slice %arg9[%9] : memref<2x!tpu.dma_semaphore, #tpu.memory_space<semaphore_mem>> -> memref<1x!tpu.dma_semaphore, #tpu.memory_space<semaphore_mem>>
    %22 = tpu.memref_squeeze %21 : memref<1x!tpu.dma_semaphore, #tpu.memory_space<semaphore_mem>> -> memref<!tpu.dma_semaphore, #tpu.memory_space<semaphore_mem>>
    tpu.wait_dma2 semaphore(%22 : memref<!tpu.dma_semaphore, #tpu.memory_space<semaphore_mem>>) src(%18 : memref<16x2688xbf16, #tpu.memory_space<any>>) dst(%20 : memref<16x2688xbf16, #tpu.memory_space<vmem>>)
    %c1_i32_9 = arith.constant 1 : i32
    %23 = arith.addi %arg2, %c1_i32_9 : i32
    %c2_i32_10 = arith.constant 2 : i32
    %24 = arith.cmpi slt, %23, %c2_i32_10 : i32
    %25 = arith.extui %24 : i1 to i32
    %c0_i32_11 = arith.constant 0 : i32
    %26 = arith.cmpi ne, %25, %c0_i32_11 : i32
    scf.if %26 {
      %176 = arith.addi %10, %arg2 : i32
      %c1_i32_154 = arith.constant 1 : i32
      %177 = arith.addi %176, %c1_i32_154 : i32
      %c1_i32_155 = arith.constant 1 : i32
      %178 = arith.subi %c1_i32_155, %9 : i32
      %c2048_i32_156 = arith.constant 2048 : i32
      %179 = arith.muli %177, %c2048_i32_156 : i32
      %180 = tpu.assume_multiple %179, 128 : i32
      %c0_i32_157 = arith.constant 0 : i32
      %181 = tpu.memref_slice %arg3[%arg0, %c0_i32_157, %180] : memref<2x16x8832xbf16, #tpu.memory_space<any>> -> memref<1x16x2688xbf16, #tpu.memory_space<any>>
      %182 = tpu.memref_squeeze %181 : memref<1x16x2688xbf16, #tpu.memory_space<any>> -> memref<16x2688xbf16, #tpu.memory_space<any>>
      %c0_i32_158 = arith.constant 0 : i32
      %c0_i32_159 = arith.constant 0 : i32
      %183 = tpu.memref_slice %arg7[%178, %c0_i32_158, %c0_i32_159] : memref<2x16x2688xbf16, #tpu.memory_space<vmem>> -> memref<1x16x2688xbf16, #tpu.memory_space<vmem>>
      %184 = tpu.memref_squeeze %183 : memref<1x16x2688xbf16, #tpu.memory_space<vmem>> -> memref<16x2688xbf16, #tpu.memory_space<vmem>>
      %185 = tpu.memref_slice %arg9[%178] : memref<2x!tpu.dma_semaphore, #tpu.memory_space<semaphore_mem>> -> memref<1x!tpu.dma_semaphore, #tpu.memory_space<semaphore_mem>>
      %186 = tpu.memref_squeeze %185 : memref<1x!tpu.dma_semaphore, #tpu.memory_space<semaphore_mem>> -> memref<!tpu.dma_semaphore, #tpu.memory_space<semaphore_mem>>
      tpu.enqueue_dma source(%182 : memref<16x2688xbf16, #tpu.memory_space<any>>) target(%184 : memref<16x2688xbf16, #tpu.memory_space<vmem>>) target_semaphore(%186 : memref<!tpu.dma_semaphore, #tpu.memory_space<semaphore_mem>>)
    } else {
    }
    %c0_i32_12 = arith.constant 0 : i32
    %c0_i32_13 = arith.constant 0 : i32
    %27 = tpu.memref_slice %arg7[%9, %c0_i32_12, %c0_i32_13] : memref<2x16x2688xbf16, #tpu.memory_space<vmem>> -> memref<1x16x2688xbf16, #tpu.memory_space<vmem>>
    %28 = tpu.memref_squeeze %27 : memref<1x16x2688xbf16, #tpu.memory_space<vmem>> -> memref<16x2688xbf16, #tpu.memory_space<vmem>>
    %c0 = arith.constant 0 : index
    %c0_14 = arith.constant 0 : index
    %29 = vector.load %28[%c0, %c0_14] : memref<16x2688xbf16, #tpu.memory_space<vmem>>, vector<16x2560xbf16>
    %c0_15 = arith.constant 0 : index
    %c0_16 = arith.constant 0 : index
    %30 = vector.load %arg8[%c0_15, %c0_16] : memref<80x2560xbf16, #tpu.memory_space<vmem>>, vector<16x2560xbf16>
    tpu.vector_store %arg8[%c0_15, %c0_16], %29 {strides = array<i32>} : memref<80x2560xbf16, #tpu.memory_space<vmem>>, vector<16x2560xbf16>,
    %c0_i32_17 = arith.constant 0 : i32
    %c0_i32_18 = arith.constant 0 : i32
    %31 = tpu.memref_slice %arg7[%9, %c0_i32_17, %c0_i32_18] : memref<2x16x2688xbf16, #tpu.memory_space<vmem>> -> memref<1x16x2688xbf16, #tpu.memory_space<vmem>>
    %32 = tpu.memref_squeeze %31 : memref<1x16x2688xbf16, #tpu.memory_space<vmem>> -> memref<16x2688xbf16, #tpu.memory_space<vmem>>
    %c0_19 = arith.constant 0 : index
    %c1 = arith.constant 1 : index
    %33 = vector.load %32[%c0_19, %c1] : memref<16x2688xbf16, #tpu.memory_space<vmem>>, vector<16x2560xbf16>
    %c16 = arith.constant 16 : index
    %c0_20 = arith.constant 0 : index
    %34 = vector.load %arg8[%c16, %c0_20] : memref<80x2560xbf16, #tpu.memory_space<vmem>>, vector<16x2560xbf16>
    tpu.vector_store %arg8[%c16, %c0_20], %33 {strides = array<i32>} : memref<80x2560xbf16, #tpu.memory_space<vmem>>, vector<16x2560xbf16>,
    %c0_i32_21 = arith.constant 0 : i32
    %c0_i32_22 = arith.constant 0 : i32
    %35 = tpu.memref_slice %arg7[%9, %c0_i32_21, %c0_i32_22] : memref<2x16x2688xbf16, #tpu.memory_space<vmem>> -> memref<1x16x2688xbf16, #tpu.memory_space<vmem>>
    %36 = tpu.memref_squeeze %35 : memref<1x16x2688xbf16, #tpu.memory_space<vmem>> -> memref<16x2688xbf16, #tpu.memory_space<vmem>>
    %c0_23 = arith.constant 0 : index
    %c2 = arith.constant 2 : index
    %37 = vector.load %36[%c0_23, %c2] : memref<16x2688xbf16, #tpu.memory_space<vmem>>, vector<16x2560xbf16>
    %c32 = arith.constant 32 : index
    %c0_24 = arith.constant 0 : index
    %38 = vector.load %arg8[%c32, %c0_24] : memref<80x2560xbf16, #tpu.memory_space<vmem>>, vector<16x2560xbf16>
    tpu.vector_store %arg8[%c32, %c0_24], %37 {strides = array<i32>} : memref<80x2560xbf16, #tpu.memory_space<vmem>>, vector<16x2560xbf16>,
    %c0_i32_25 = arith.constant 0 : i32
    %c0_i32_26 = arith.constant 0 : i32
    %39 = tpu.memref_slice %arg7[%9, %c0_i32_25, %c0_i32_26] : memref<2x16x2688xbf16, #tpu.memory_space<vmem>> -> memref<1x16x2688xbf16, #tpu.memory_space<vmem>>
    %40 = tpu.memref_squeeze %39 : memref<1x16x2688xbf16, #tpu.memory_space<vmem>> -> memref<16x2688xbf16, #tpu.memory_space<vmem>>
    %c0_27 = arith.constant 0 : index
    %c3 = arith.constant 3 : index
    %41 = vector.load %40[%c0_27, %c3] : memref<16x2688xbf16, #tpu.memory_space<vmem>>, vector<16x2560xbf16>
    %c48 = arith.constant 48 : index
    %c0_28 = arith.constant 0 : index
    %42 = vector.load %arg8[%c48, %c0_28] : memref<80x2560xbf16, #tpu.memory_space<vmem>>, vector<16x2560xbf16>
    tpu.vector_store %arg8[%c48, %c0_28], %41 {strides = array<i32>} : memref<80x2560xbf16, #tpu.memory_space<vmem>>, vector<16x2560xbf16>,
    %c0_i32_29 = arith.constant 0 : i32
    %c0_i32_30 = arith.constant 0 : i32
    %43 = tpu.memref_slice %arg7[%9, %c0_i32_29, %c0_i32_30] : memref<2x16x2688xbf16, #tpu.memory_space<vmem>> -> memref<1x16x2688xbf16, #tpu.memory_space<vmem>>
    %44 = tpu.memref_squeeze %43 : memref<1x16x2688xbf16, #tpu.memory_space<vmem>> -> memref<16x2688xbf16, #tpu.memory_space<vmem>>
    %c0_31 = arith.constant 0 : index
    %c4 = arith.constant 4 : index
    %45 = vector.load %44[%c0_31, %c4] : memref<16x2688xbf16, #tpu.memory_space<vmem>>, vector<16x2560xbf16>
    %c64 = arith.constant 64 : index
    %c0_32 = arith.constant 0 : index
    %46 = vector.load %arg8[%c64, %c0_32] : memref<80x2560xbf16, #tpu.memory_space<vmem>>, vector<16x2560xbf16>
    tpu.vector_store %arg8[%c64, %c0_32], %45 {strides = array<i32>} : memref<80x2560xbf16, #tpu.memory_space<vmem>>, vector<16x2560xbf16>,
    %c0_33 = arith.constant 0 : index
    %c0_34 = arith.constant 0 : index
    %47 = vector.load %arg5[%c0_33, %c0_34] : memref<8x1xf32, #tpu.memory_space<vmem>>, vector<8x1xf32>
    %cst = arith.constant 0.000000e+00 : f32
    %48 = vector.broadcast %cst : f32 to vector<8x512xf32>
    %c0_35 = arith.constant 0 : index
    %c0_36 = arith.constant 0 : index
    %c0_37 = arith.constant 0 : index
    %49 = vector.load %arg4[%c0_35, %c0_36, %c0_37] : memref<5x8x80xbf16, #tpu.memory_space<vmem>>, vector<1x8x80xbf16>
    %50 = vector.shape_cast %49 : vector<1x8x80xbf16> to vector<8x80xbf16>
    %c0_38 = arith.constant 0 : index
    %c0_39 = arith.constant 0 : index
    %51 = vector.load %arg8[%c0_38, %c0_39] : memref<80x2560xbf16, #tpu.memory_space<vmem>>, vector<80x512xbf16>
    %cst_40 = arith.constant dense<0.000000e+00> : vector<8x512xf32>
    %52 = tpu.matmul %50, %51, %cst_40 {dimension_numbers = #tpu.dot_dimension_numbers<[1], [0], [0], [1], [0, 0, 1, 1], [], []>} : vector<8x80xbf16>, vector<80x512xbf16>, vector<8x512xf32> -> vector<8x512xf32>
    %53 = arith.addf %48, %52 : vector<8x512xf32>
    %c1_41 = arith.constant 1 : index
    %c0_42 = arith.constant 0 : index
    %c0_43 = arith.constant 0 : index
    %54 = vector.load %arg4[%c1_41, %c0_42, %c0_43] : memref<5x8x80xbf16, #tpu.memory_space<vmem>>, vector<1x8x80xbf16>
    %55 = vector.shape_cast %54 : vector<1x8x80xbf16> to vector<8x80xbf16>
    %c0_44 = arith.constant 0 : index
    %c128 = arith.constant 128 : index
    %56 = vector.load %arg8[%c0_44, %c128] : memref<80x2560xbf16, #tpu.memory_space<vmem>>, vector<80x512xbf16>
    %cst_45 = arith.constant dense<0.000000e+00> : vector<8x512xf32>
    %57 = tpu.matmul %55, %56, %cst_45 {dimension_numbers = #tpu.dot_dimension_numbers<[1], [0], [0], [1], [0, 0, 1, 1], [], []>} : vector<8x80xbf16>, vector<80x512xbf16>, vector<8x512xf32> -> vector<8x512xf32>
    %58 = arith.addf %53, %57 : vector<8x512xf32>
    %c2_46 = arith.constant 2 : index
    %c0_47 = arith.constant 0 : index
    %c0_48 = arith.constant 0 : index
    %59 = vector.load %arg4[%c2_46, %c0_47, %c0_48] : memref<5x8x80xbf16, #tpu.memory_space<vmem>>, vector<1x8x80xbf16>
    %60 = vector.shape_cast %59 : vector<1x8x80xbf16> to vector<8x80xbf16>
    %c0_49 = arith.constant 0 : index
    %c256 = arith.constant 256 : index
    %61 = vector.load %arg8[%c0_49, %c256] : memref<80x2560xbf16, #tpu.memory_space<vmem>>, vector<80x512xbf16>
    %cst_50 = arith.constant dense<0.000000e+00> : vector<8x512xf32>
    %62 = tpu.matmul %60, %61, %cst_50 {dimension_numbers = #tpu.dot_dimension_numbers<[1], [0], [0], [1], [0, 0, 1, 1], [], []>} : vector<8x80xbf16>, vector<80x512xbf16>, vector<8x512xf32> -> vector<8x512xf32>
    %63 = arith.addf %58, %62 : vector<8x512xf32>
    %c3_51 = arith.constant 3 : index
    %c0_52 = arith.constant 0 : index
    %c0_53 = arith.constant 0 : index
    %64 = vector.load %arg4[%c3_51, %c0_52, %c0_53] : memref<5x8x80xbf16, #tpu.memory_space<vmem>>, vector<1x8x80xbf16>
    %65 = vector.shape_cast %64 : vector<1x8x80xbf16> to vector<8x80xbf16>
    %c0_54 = arith.constant 0 : index
    %c384 = arith.constant 384 : index
    %66 = vector.load %arg8[%c0_54, %c384] : memref<80x2560xbf16, #tpu.memory_space<vmem>>, vector<80x512xbf16>
    %cst_55 = arith.constant dense<0.000000e+00> : vector<8x512xf32>
    %67 = tpu.matmul %65, %66, %cst_55 {dimension_numbers = #tpu.dot_dimension_numbers<[1], [0], [0], [1], [0, 0, 1, 1], [], []>} : vector<8x80xbf16>, vector<80x512xbf16>, vector<8x512xf32> -> vector<8x512xf32>
    %68 = arith.addf %63, %67 : vector<8x512xf32>
    %c4_56 = arith.constant 4 : index
    %c0_57 = arith.constant 0 : index
    %c0_58 = arith.constant 0 : index
    %69 = vector.load %arg4[%c4_56, %c0_57, %c0_58] : memref<5x8x80xbf16, #tpu.memory_space<vmem>>, vector<1x8x80xbf16>
    %70 = vector.shape_cast %69 : vector<1x8x80xbf16> to vector<8x80xbf16>
    %c0_59 = arith.constant 0 : index
    %c512 = arith.constant 512 : index
    %71 = vector.load %arg8[%c0_59, %c512] : memref<80x2560xbf16, #tpu.memory_space<vmem>>, vector<80x512xbf16>
    %cst_60 = arith.constant dense<0.000000e+00> : vector<8x512xf32>
    %72 = tpu.matmul %70, %71, %cst_60 {dimension_numbers = #tpu.dot_dimension_numbers<[1], [0], [0], [1], [0, 0, 1, 1], [], []>} : vector<8x80xbf16>, vector<80x512xbf16>, vector<8x512xf32> -> vector<8x512xf32>
    %73 = arith.addf %68, %72 : vector<8x512xf32>
    %74 = vector.broadcast %47 : vector<8x1xf32> to vector<8x512xf32>
    %75 = arith.addf %73, %74 : vector<8x512xf32>
    %76 = arith.truncf %75 : vector<8x512xf32> to vector<8x512xbf16>
    %c0_61 = arith.constant 0 : index
    %c0_62 = arith.constant 0 : index
    %c0_63 = arith.constant 0 : index
    %77 = vector.load %arg6[%c0_61, %c0_62, %c0_63] : memref<1x8x2048xbf16, #tpu.memory_space<vmem>>, vector<1x8x512xbf16>
    %78 = vector.shape_cast %77 : vector<1x8x512xbf16> to vector<8x512xbf16>
    %79 = vector.shape_cast %76 : vector<8x512xbf16> to vector<1x8x512xbf16>
    tpu.vector_store %arg6[%c0_61, %c0_62, %c0_63], %79 {strides = array<i32>} : memref<1x8x2048xbf16, #tpu.memory_space<vmem>>, vector<1x8x512xbf16>,
    %cst_64 = arith.constant 0.000000e+00 : f32
    %80 = vector.broadcast %cst_64 : f32 to vector<8x512xf32>
    %c0_65 = arith.constant 0 : index
    %c0_66 = arith.constant 0 : index
    %c0_67 = arith.constant 0 : index
    %81 = vector.load %arg4[%c0_65, %c0_66, %c0_67] : memref<5x8x80xbf16, #tpu.memory_space<vmem>>, vector<1x8x80xbf16>
    %82 = vector.shape_cast %81 : vector<1x8x80xbf16> to vector<8x80xbf16>
    %c0_68 = arith.constant 0 : index
    %c512_69 = arith.constant 512 : index
    %83 = vector.load %arg8[%c0_68, %c512_69] : memref<80x2560xbf16, #tpu.memory_space<vmem>>, vector<80x512xbf16>
    %cst_70 = arith.constant dense<0.000000e+00> : vector<8x512xf32>
    %84 = tpu.matmul %82, %83, %cst_70 {dimension_numbers = #tpu.dot_dimension_numbers<[1], [0], [0], [1], [0, 0, 1, 1], [], []>} : vector<8x80xbf16>, vector<80x512xbf16>, vector<8x512xf32> -> vector<8x512xf32>
    %85 = arith.addf %80, %84 : vector<8x512xf32>
    %c1_71 = arith.constant 1 : index
    %c0_72 = arith.constant 0 : index
    %c0_73 = arith.constant 0 : index
    %86 = vector.load %arg4[%c1_71, %c0_72, %c0_73] : memref<5x8x80xbf16, #tpu.memory_space<vmem>>, vector<1x8x80xbf16>
    %87 = vector.shape_cast %86 : vector<1x8x80xbf16> to vector<8x80xbf16>
    %c0_74 = arith.constant 0 : index
    %c640 = arith.constant 640 : index
    %88 = vector.load %arg8[%c0_74, %c640] : memref<80x2560xbf16, #tpu.memory_space<vmem>>, vector<80x512xbf16>
    %cst_75 = arith.constant dense<0.000000e+00> : vector<8x512xf32>
    %89 = tpu.matmul %87, %88, %cst_75 {dimension_numbers = #tpu.dot_dimension_numbers<[1], [0], [0], [1], [0, 0, 1, 1], [], []>} : vector<8x80xbf16>, vector<80x512xbf16>, vector<8x512xf32> -> vector<8x512xf32>
    %90 = arith.addf %85, %89 : vector<8x512xf32>
    %c2_76 = arith.constant 2 : index
    %c0_77 = arith.constant 0 : index
    %c0_78 = arith.constant 0 : index
    %91 = vector.load %arg4[%c2_76, %c0_77, %c0_78] : memref<5x8x80xbf16, #tpu.memory_space<vmem>>, vector<1x8x80xbf16>
    %92 = vector.shape_cast %91 : vector<1x8x80xbf16> to vector<8x80xbf16>
    %c0_79 = arith.constant 0 : index
    %c768 = arith.constant 768 : index
    %93 = vector.load %arg8[%c0_79, %c768] : memref<80x2560xbf16, #tpu.memory_space<vmem>>, vector<80x512xbf16>
    %cst_80 = arith.constant dense<0.000000e+00> : vector<8x512xf32>
    %94 = tpu.matmul %92, %93, %cst_80 {dimension_numbers = #tpu.dot_dimension_numbers<[1], [0], [0], [1], [0, 0, 1, 1], [], []>} : vector<8x80xbf16>, vector<80x512xbf16>, vector<8x512xf32> -> vector<8x512xf32>
    %95 = arith.addf %90, %94 : vector<8x512xf32>
    %c3_81 = arith.constant 3 : index
    %c0_82 = arith.constant 0 : index
    %c0_83 = arith.constant 0 : index
    %96 = vector.load %arg4[%c3_81, %c0_82, %c0_83] : memref<5x8x80xbf16, #tpu.memory_space<vmem>>, vector<1x8x80xbf16>
    %97 = vector.shape_cast %96 : vector<1x8x80xbf16> to vector<8x80xbf16>
    %c0_84 = arith.constant 0 : index
    %c896 = arith.constant 896 : index
    %98 = vector.load %arg8[%c0_84, %c896] : memref<80x2560xbf16, #tpu.memory_space<vmem>>, vector<80x512xbf16>
    %cst_85 = arith.constant dense<0.000000e+00> : vector<8x512xf32>
    %99 = tpu.matmul %97, %98, %cst_85 {dimension_numbers = #tpu.dot_dimension_numbers<[1], [0], [0], [1], [0, 0, 1, 1], [], []>} : vector<8x80xbf16>, vector<80x512xbf16>, vector<8x512xf32> -> vector<8x512xf32>
    %100 = arith.addf %95, %99 : vector<8x512xf32>
    %c4_86 = arith.constant 4 : index
    %c0_87 = arith.constant 0 : index
    %c0_88 = arith.constant 0 : index
    %101 = vector.load %arg4[%c4_86, %c0_87, %c0_88] : memref<5x8x80xbf16, #tpu.memory_space<vmem>>, vector<1x8x80xbf16>
    %102 = vector.shape_cast %101 : vector<1x8x80xbf16> to vector<8x80xbf16>
    %c0_89 = arith.constant 0 : index
    %c1024 = arith.constant 1024 : index
    %103 = vector.load %arg8[%c0_89, %c1024] : memref<80x2560xbf16, #tpu.memory_space<vmem>>, vector<80x512xbf16>
    %cst_90 = arith.constant dense<0.000000e+00> : vector<8x512xf32>
    %104 = tpu.matmul %102, %103, %cst_90 {dimension_numbers = #tpu.dot_dimension_numbers<[1], [0], [0], [1], [0, 0, 1, 1], [], []>} : vector<8x80xbf16>, vector<80x512xbf16>, vector<8x512xf32> -> vector<8x512xf32>
    %105 = arith.addf %100, %104 : vector<8x512xf32>
    %106 = vector.broadcast %47 : vector<8x1xf32> to vector<8x512xf32>
    %107 = arith.addf %105, %106 : vector<8x512xf32>
    %108 = arith.truncf %107 : vector<8x512xf32> to vector<8x512xbf16>
    %c0_91 = arith.constant 0 : index
    %c0_92 = arith.constant 0 : index
    %c512_93 = arith.constant 512 : index
    %109 = vector.load %arg6[%c0_91, %c0_92, %c512_93] : memref<1x8x2048xbf16, #tpu.memory_space<vmem>>, vector<1x8x512xbf16>
    %110 = vector.shape_cast %109 : vector<1x8x512xbf16> to vector<8x512xbf16>
    %111 = vector.shape_cast %108 : vector<8x512xbf16> to vector<1x8x512xbf16>
    tpu.vector_store %arg6[%c0_91, %c0_92, %c512_93], %111 {strides = array<i32>} : memref<1x8x2048xbf16, #tpu.memory_space<vmem>>, vector<1x8x512xbf16>,
    %cst_94 = arith.constant 0.000000e+00 : f32
    %112 = vector.broadcast %cst_94 : f32 to vector<8x512xf32>
    %c0_95 = arith.constant 0 : index
    %c0_96 = arith.constant 0 : index
    %c0_97 = arith.constant 0 : index
    %113 = vector.load %arg4[%c0_95, %c0_96, %c0_97] : memref<5x8x80xbf16, #tpu.memory_space<vmem>>, vector<1x8x80xbf16>
    %114 = vector.shape_cast %113 : vector<1x8x80xbf16> to vector<8x80xbf16>
    %c0_98 = arith.constant 0 : index
    %c1024_99 = arith.constant 1024 : index
    %115 = vector.load %arg8[%c0_98, %c1024_99] : memref<80x2560xbf16, #tpu.memory_space<vmem>>, vector<80x512xbf16>
    %cst_100 = arith.constant dense<0.000000e+00> : vector<8x512xf32>
    %116 = tpu.matmul %114, %115, %cst_100 {dimension_numbers = #tpu.dot_dimension_numbers<[1], [0], [0], [1], [0, 0, 1, 1], [], []>} : vector<8x80xbf16>, vector<80x512xbf16>, vector<8x512xf32> -> vector<8x512xf32>
    %117 = arith.addf %112, %116 : vector<8x512xf32>
    %c1_101 = arith.constant 1 : index
    %c0_102 = arith.constant 0 : index
    %c0_103 = arith.constant 0 : index
    %118 = vector.load %arg4[%c1_101, %c0_102, %c0_103] : memref<5x8x80xbf16, #tpu.memory_space<vmem>>, vector<1x8x80xbf16>
    %119 = vector.shape_cast %118 : vector<1x8x80xbf16> to vector<8x80xbf16>
    %c0_104 = arith.constant 0 : index
    %c1152 = arith.constant 1152 : index
    %120 = vector.load %arg8[%c0_104, %c1152] : memref<80x2560xbf16, #tpu.memory_space<vmem>>, vector<80x512xbf16>
    %cst_105 = arith.constant dense<0.000000e+00> : vector<8x512xf32>
    %121 = tpu.matmul %119, %120, %cst_105 {dimension_numbers = #tpu.dot_dimension_numbers<[1], [0], [0], [1], [0, 0, 1, 1], [], []>} : vector<8x80xbf16>, vector<80x512xbf16>, vector<8x512xf32> -> vector<8x512xf32>
    %122 = arith.addf %117, %121 : vector<8x512xf32>
    %c2_106 = arith.constant 2 : index
    %c0_107 = arith.constant 0 : index
    %c0_108 = arith.constant 0 : index
    %123 = vector.load %arg4[%c2_106, %c0_107, %c0_108] : memref<5x8x80xbf16, #tpu.memory_space<vmem>>, vector<1x8x80xbf16>
    %124 = vector.shape_cast %123 : vector<1x8x80xbf16> to vector<8x80xbf16>
    %c0_109 = arith.constant 0 : index
    %c1280 = arith.constant 1280 : index
    %125 = vector.load %arg8[%c0_109, %c1280] : memref<80x2560xbf16, #tpu.memory_space<vmem>>, vector<80x512xbf16>
    %cst_110 = arith.constant dense<0.000000e+00> : vector<8x512xf32>
    %126 = tpu.matmul %124, %125, %cst_110 {dimension_numbers = #tpu.dot_dimension_numbers<[1], [0], [0], [1], [0, 0, 1, 1], [], []>} : vector<8x80xbf16>, vector<80x512xbf16>, vector<8x512xf32> -> vector<8x512xf32>
    %127 = arith.addf %122, %126 : vector<8x512xf32>
    %c3_111 = arith.constant 3 : index
    %c0_112 = arith.constant 0 : index
    %c0_113 = arith.constant 0 : index
    %128 = vector.load %arg4[%c3_111, %c0_112, %c0_113] : memref<5x8x80xbf16, #tpu.memory_space<vmem>>, vector<1x8x80xbf16>
    %129 = vector.shape_cast %128 : vector<1x8x80xbf16> to vector<8x80xbf16>
    %c0_114 = arith.constant 0 : index
    %c1408 = arith.constant 1408 : index
    %130 = vector.load %arg8[%c0_114, %c1408] : memref<80x2560xbf16, #tpu.memory_space<vmem>>, vector<80x512xbf16>
    %cst_115 = arith.constant dense<0.000000e+00> : vector<8x512xf32>
    %131 = tpu.matmul %129, %130, %cst_115 {dimension_numbers = #tpu.dot_dimension_numbers<[1], [0], [0], [1], [0, 0, 1, 1], [], []>} : vector<8x80xbf16>, vector<80x512xbf16>, vector<8x512xf32> -> vector<8x512xf32>
    %132 = arith.addf %127, %131 : vector<8x512xf32>
    %c4_116 = arith.constant 4 : index
    %c0_117 = arith.constant 0 : index
    %c0_118 = arith.constant 0 : index
    %133 = vector.load %arg4[%c4_116, %c0_117, %c0_118] : memref<5x8x80xbf16, #tpu.memory_space<vmem>>, vector<1x8x80xbf16>
    %134 = vector.shape_cast %133 : vector<1x8x80xbf16> to vector<8x80xbf16>
    %c0_119 = arith.constant 0 : index
    %c1536 = arith.constant 1536 : index
    %135 = vector.load %arg8[%c0_119, %c1536] : memref<80x2560xbf16, #tpu.memory_space<vmem>>, vector<80x512xbf16>
    %cst_120 = arith.constant dense<0.000000e+00> : vector<8x512xf32>
    %136 = tpu.matmul %134, %135, %cst_120 {dimension_numbers = #tpu.dot_dimension_numbers<[1], [0], [0], [1], [0, 0, 1, 1], [], []>} : vector<8x80xbf16>, vector<80x512xbf16>, vector<8x512xf32> -> vector<8x512xf32>
    %137 = arith.addf %132, %136 : vector<8x512xf32>
    %138 = vector.broadcast %47 : vector<8x1xf32> to vector<8x512xf32>
    %139 = arith.addf %137, %138 : vector<8x512xf32>
    %140 = arith.truncf %139 : vector<8x512xf32> to vector<8x512xbf16>
    %c0_121 = arith.constant 0 : index
    %c0_122 = arith.constant 0 : index
    %c1024_123 = arith.constant 1024 : index
    %141 = vector.load %arg6[%c0_121, %c0_122, %c1024_123] : memref<1x8x2048xbf16, #tpu.memory_space<vmem>>, vector<1x8x512xbf16>
    %142 = vector.shape_cast %141 : vector<1x8x512xbf16> to vector<8x512xbf16>
    %143 = vector.shape_cast %140 : vector<8x512xbf16> to vector<1x8x512xbf16>
    tpu.vector_store %arg6[%c0_121, %c0_122, %c1024_123], %143 {strides = array<i32>} : memref<1x8x2048xbf16, #tpu.memory_space<vmem>>, vector<1x8x512xbf16>,
    %cst_124 = arith.constant 0.000000e+00 : f32
    %144 = vector.broadcast %cst_124 : f32 to vector<8x512xf32>
    %c0_125 = arith.constant 0 : index
    %c0_126 = arith.constant 0 : index
    %c0_127 = arith.constant 0 : index
    %145 = vector.load %arg4[%c0_125, %c0_126, %c0_127] : memref<5x8x80xbf16, #tpu.memory_space<vmem>>, vector<1x8x80xbf16>
    %146 = vector.shape_cast %145 : vector<1x8x80xbf16> to vector<8x80xbf16>
    %c0_128 = arith.constant 0 : index
    %c1536_129 = arith.constant 1536 : index
    %147 = vector.load %arg8[%c0_128, %c1536_129] : memref<80x2560xbf16, #tpu.memory_space<vmem>>, vector<80x512xbf16>
    %cst_130 = arith.constant dense<0.000000e+00> : vector<8x512xf32>
    %148 = tpu.matmul %146, %147, %cst_130 {dimension_numbers = #tpu.dot_dimension_numbers<[1], [0], [0], [1], [0, 0, 1, 1], [], []>} : vector<8x80xbf16>, vector<80x512xbf16>, vector<8x512xf32> -> vector<8x512xf32>
    %149 = arith.addf %144, %148 : vector<8x512xf32>
    %c1_131 = arith.constant 1 : index
    %c0_132 = arith.constant 0 : index
    %c0_133 = arith.constant 0 : index
    %150 = vector.load %arg4[%c1_131, %c0_132, %c0_133] : memref<5x8x80xbf16, #tpu.memory_space<vmem>>, vector<1x8x80xbf16>
    %151 = vector.shape_cast %150 : vector<1x8x80xbf16> to vector<8x80xbf16>
    %c0_134 = arith.constant 0 : index
    %c1664 = arith.constant 1664 : index
    %152 = vector.load %arg8[%c0_134, %c1664] : memref<80x2560xbf16, #tpu.memory_space<vmem>>, vector<80x512xbf16>
    %cst_135 = arith.constant dense<0.000000e+00> : vector<8x512xf32>
    %153 = tpu.matmul %151, %152, %cst_135 {dimension_numbers = #tpu.dot_dimension_numbers<[1], [0], [0], [1], [0, 0, 1, 1], [], []>} : vector<8x80xbf16>, vector<80x512xbf16>, vector<8x512xf32> -> vector<8x512xf32>
    %154 = arith.addf %149, %153 : vector<8x512xf32>
    %c2_136 = arith.constant 2 : index
    %c0_137 = arith.constant 0 : index
    %c0_138 = arith.constant 0 : index
    %155 = vector.load %arg4[%c2_136, %c0_137, %c0_138] : memref<5x8x80xbf16, #tpu.memory_space<vmem>>, vector<1x8x80xbf16>
    %156 = vector.shape_cast %155 : vector<1x8x80xbf16> to vector<8x80xbf16>
    %c0_139 = arith.constant 0 : index
    %c1792 = arith.constant 1792 : index
    %157 = vector.load %arg8[%c0_139, %c1792] : memref<80x2560xbf16, #tpu.memory_space<vmem>>, vector<80x512xbf16>
    %cst_140 = arith.constant dense<0.000000e+00> : vector<8x512xf32>
    %158 = tpu.matmul %156, %157, %cst_140 {dimension_numbers = #tpu.dot_dimension_numbers<[1], [0], [0], [1], [0, 0, 1, 1], [], []>} : vector<8x80xbf16>, vector<80x512xbf16>, vector<8x512xf32> -> vector<8x512xf32>
    %159 = arith.addf %154, %158 : vector<8x512xf32>
    %c3_141 = arith.constant 3 : index
    %c0_142 = arith.constant 0 : index
    %c0_143 = arith.constant 0 : index
    %160 = vector.load %arg4[%c3_141, %c0_142, %c0_143] : memref<5x8x80xbf16, #tpu.memory_space<vmem>>, vector<1x8x80xbf16>
    %161 = vector.shape_cast %160 : vector<1x8x80xbf16> to vector<8x80xbf16>
    %c0_144 = arith.constant 0 : index
    %c1920 = arith.constant 1920 : index
    %162 = vector.load %arg8[%c0_144, %c1920] : memref<80x2560xbf16, #tpu.memory_space<vmem>>, vector<80x512xbf16>
    %cst_145 = arith.constant dense<0.000000e+00> : vector<8x512xf32>
    %163 = tpu.matmul %161, %162, %cst_145 {dimension_numbers = #tpu.dot_dimension_numbers<[1], [0], [0], [1], [0, 0, 1, 1], [], []>} : vector<8x80xbf16>, vector<80x512xbf16>, vector<8x512xf32> -> vector<8x512xf32>
    %164 = arith.addf %159, %163 : vector<8x512xf32>
    %c4_146 = arith.constant 4 : index
    %c0_147 = arith.constant 0 : index
    %c0_148 = arith.constant 0 : index
    %165 = vector.load %arg4[%c4_146, %c0_147, %c0_148] : memref<5x8x80xbf16, #tpu.memory_space<vmem>>, vector<1x8x80xbf16>
    %166 = vector.shape_cast %165 : vector<1x8x80xbf16> to vector<8x80xbf16>
    %c0_149 = arith.constant 0 : index
    %c2048 = arith.constant 2048 : index
    %167 = vector.load %arg8[%c0_149, %c2048] : memref<80x2560xbf16, #tpu.memory_space<vmem>>, vector<80x512xbf16>
    %cst_150 = arith.constant dense<0.000000e+00> : vector<8x512xf32>
    %168 = tpu.matmul %166, %167, %cst_150 {dimension_numbers = #tpu.dot_dimension_numbers<[1], [0], [0], [1], [0, 0, 1, 1], [], []>} : vector<8x80xbf16>, vector<80x512xbf16>, vector<8x512xf32> -> vector<8x512xf32>
    %169 = arith.addf %164, %168 : vector<8x512xf32>
    %170 = vector.broadcast %47 : vector<8x1xf32> to vector<8x512xf32>
    %171 = arith.addf %169, %170 : vector<8x512xf32>
    %172 = arith.truncf %171 : vector<8x512xf32> to vector<8x512xbf16>
    %c0_151 = arith.constant 0 : index
    %c0_152 = arith.constant 0 : index
    %c1536_153 = arith.constant 1536 : index
    %173 = vector.load %arg6[%c0_151, %c0_152, %c1536_153] : memref<1x8x2048xbf16, #tpu.memory_space<vmem>>, vector<1x8x512xbf16>
    %174 = vector.shape_cast %173 : vector<1x8x512xbf16> to vector<8x512xbf16>
    %175 = vector.shape_cast %172 : vector<8x512xbf16> to vector<1x8x512xbf16>
    tpu.vector_store %arg6[%c0_151, %c0_152, %c1536_153], %175 {strides = array<i32>} : memref<1x8x2048xbf16, #tpu.memory_space<vmem>>, vector<1x8x512xbf16>,
    return
  }
  func.func @transform_1(%arg0: i32, %arg1: i32, %arg2: i32) -> (i32, i32, i32) {
    %c0_i32 = arith.constant 0 : i32
    %c0_i32_0 = arith.constant 0 : i32
    %c0_i32_1 = arith.constant 0 : i32
    %c0_i32_2 = arith.constant 0 : i32
    return %c0_i32, %c0_i32_0, %c0_i32_1 : i32, i32, i32
  }
  func.func @transform_2(%arg0: i32, %arg1: i32, %arg2: i32) -> (i32, i32) {
    %c0_i32 = arith.constant 0 : i32
    %c0_i32_0 = arith.constant 0 : i32
    %c0_i32_1 = arith.constant 0 : i32
    return %c0_i32, %c0_i32_0 : i32, i32
  }
  func.func @transform_3(%arg0: i32, %arg1: i32, %arg2: i32) -> (i32, i32, i32) {
    %c2_i32 = arith.constant 2 : i32
    %0 = arith.muli %arg1, %c2_i32 : i32
    %1 = arith.addi %0, %arg2 : i32
    %c0_i32 = arith.constant 0 : i32
    %c0_i32_0 = arith.constant 0 : i32
    return %arg0, %c0_i32, %1 : i32, i32, i32
  }
}

</mosaic_0001>

<bundles_post_ra>
// kernel: tpu_custom_call.1
= control target key start
LH: loop header
LB: loop body
LE: loop exit
PB: predicated region body
PF: predicated region fallthrough
CT: control target
= control target key end

     0   :  { %s4963_s0 = inlined_call_operand.hbm [shape: bf16[2,16,8832], index: 0, kind: input, shape index: {}]   ;;  %s4964_s1 = inlined_call_operand.hbm [shape: bf16[5,8,80], index: 1, kind: input, shape index: {}]   ;;  %s4965_s2 = inlined_call_operand.vmem [shape: f32[8,1], index: 2, kind: input, shape index: {}]   ;;  %s4966_s3 = inlined_call_operand.hbm [shape: bf16[2,8,8192], index: 3, kind: output, shape index: {}]  }
   0x1   :  { %4979 = sst [smem:[#allocation24_spill]] %s4964_s1 }
   0x2   :  { %8 = vsyncpa [#allocation6], 0 }
   0x3   :  { %9 = vsyncpa [#allocation7], 0 }
   0x4   :  { %11 = vsyncpa [#allocation7 + $0x1], 0  ;;  %s3663_s12 = smov 0   ;;  %s3665_s13 = smov 0  }
   0x5   :  { %s3667_s14 = smov 0   ;;  %s3669_s15 = smov 0  }
   0x6   :  { %s3671_s16 = smov 0   ;;  %s3673_s17 = smov 0  }
   0x7   :  { %s3675_s18 = smov 0   ;;  %s3677_s19 = smov 0  }
   0x8   :  { %s3679_s20 = smov 0   ;;  %s3681_s21 = smov 0  }
   0x9 LB: > { %4980 = sst [smem:[#allocation18_spill]] %s3606_s18  ;;  %s3231_s22 = sadd.s32 4294967295, %s3618_s21   ;;  %s3618_s21 = sphi %s3681_s21, %s17_s21   ;;  %s3614_s20 = sphi %s3679_s20, %s5005_s20   ;;  %s3610_s19 = sphi %s3677_s19, %s5004_s19   ;;  %s3606_s18 = sphi %s3675_s18, %s5003_s18   ;;  %s3602_s17 = sphi %s3673_s17, %s5002_s17   ;;  %s3598_s16 = sphi %s3671_s16, %s5001_s16   ;;  %s3594_s15 = sphi %s3669_s15, %s5000_s15   ;;  %s3590_s14 = sphi %s3667_s14, %s5008_s14   ;;  %s3586_s13 = sphi %s3665_s13, %s5007_s13   ;;  %s3582_s12 = sphi %s3663_s12, %s5006_s12  }
   0xa   : > { %4981 = sst [smem:[#allocation19_spill]] %s3610_s19  ;;  %s3232_s23 = sadd.s32 4294967294, %s3618_s21  }
   0xb   : > { %4982 = sst [smem:[#allocation20_spill]] %s3614_s20  ;;  %s29_s24 = sadd.s32 1, %s3606_s18 }
   0xc   : > { %s32_s25 = sadd.s32 1, %s3610_s19  ;;  %p30_p0 = scmp.ge.s32.totalorder %s29_s24, 2 }
   0xd   : > { %s36_s26 = sadd.s32 1, %s3614_s20  ;;  %s3233_s27 = sshll.u32 %s3610_s19, 1 }
   0xe   : > { %s91_s28 = sadd.s32 1, %s3590_s14  ;;  %s5010_s24 = smov (%p30_p0, %s29_s24), 0 }
   0xf   : > { %4983 = sst [smem:[#allocation21_spill]] %s5010_s24  ;;  %s5012_s25 = smov (!%p30_p0, %s32_s25), %s3610_s19 }
  0x10   : > { %s83_s29 = sadd.s32 %s3606_s18, %s3233_s27  ;;  %p101_p1 = scmp.ne.s32.totalorder %s3590_s14, %s3586_s13 }
  0x11   : > { %p34_p2 = scmp.ge.s32.totalorder %s5012_s25, 2  ;;  %p102_p3 = scmp.eq.s32.totalorder %s3231_s22, 7 }
  0x12   : > { %p107_p4 = scmp.ne.s32.totalorder %s3586_s13, %s3582_s12  ;;  %p108_p5 = scmp.eq.s32.totalorder %s3232_s23, 7 }
  0x13   : > { %s5014_s25 = smov (%p34_p2, %s5012_s25), 0  ;;  %s5016_s26 = smov (!%p34_p2, %s36_s26), %s3614_s20 }
  0x14   : > { %4984 = sst [smem:[#allocation22_spill]] %s5014_s25  ;;  %s3234_s30 = sshll.u32 %s5014_s25, 1 }
  0x15   : > { %p3734_p6 = por %p102_p3, %p101_p1  ;;  %p38_p7 = scmp.ge.s32.totalorder %s5016_s26, 2 }
  0x16   : > { %s85_s5 = sadd.s32 %s3234_s30, %s5010_s24  ;;  %p3739_p8 = por %p108_p5, %p107_p4 }
  0x17   : > { %s4985_s4 = scalar_select %p3734_p6, 1, 0 }
  0x18   : > { %s87_s6 = ssub.s32 %s83_s29, %s85_s5  ;;  %s5018_s26 = smov (%p38_p7, %s5016_s26), 0 }
  0x19   : > { %s4986_s7 = scalar_select %p3739_p8, 1, 0 }
  0x1a   : > { %4987 = sst [smem:[#allocation23_spill]] %s5018_s26  ;;  %p3235_p9 = scmp.ge.s32.totalorder %s3618_s21, 1 }
  0x1b   : > { %p115_p10 = scmp.lt.s32.totalorder %s3618_s21, 9  ;;  %s86_s8 = ssub.s32 %s3614_s20, %s5018_s26 }
  0x1c   : > { %s88_s9 = sor.u32 %s87_s6, %s86_s8  ;;  %p3755_p13 = scmp.eq.s32.totalorder %s3231_s22, 0 }
  0x1d   : > { %p3749_p11 = pnand %p3235_p9, %p115_p10  ;;  %p89_p12 = scmp.eq.s32.totalorder %s88_s9, 0 }
  0x1e   : > { %s4989_s11 = scalar_select %p3755_p13, 1, 0 }
  0x1f   : > { %s4988_s10 = scalar_select %p3749_p11, 1, 0 }
  0x20   : > { %p3349_p0 = pneg %p3749_p11  ;;  %s3620_s27 = smov [#allocation5]  }
  0x21   : > { %s3762_s23 = scalar_select %p89_p12, %s3590_s14, %s91_s28  }
  0x22   : > { %s127_s29 = sshll.u32 %s3620_s27, 4  ;;  %p3766_p1 = pnand %p3755_p13, %p3349_p0  ;;  %s128_s29 = int_to_ptr.vmem [resolvable:$true] %s127_s29 }
  0x23   : > { %s4991_s1 = sld [smem:[#allocation24_spill]] }
  0x24   : > { %p3476_p3 = pneg %p3766_p1 }
  0x29   : > { %s3474_s22 = scalar_lea.hbm %s4991_s1, 320 }
  0x2a   : > { %p3475_p2 = scmp.ne.s32.totalorder %s4991_s1, %s3474_s22  ;;  %p3481_p7 = scmp.lt.u32.totalorder %s3474_s22, %s4991_s1 }
  0x2c   : > { %p3477_p4 = pnand %p3476_p3, %p3475_p2 }
  0x2e   : > { %p3478_p5 = pneg %p3477_p4 }
  0x30   : > { %p3483_p9 = pnand %p3481_p7, %p3478_p5 }
  0x32   : > { %3486 = shalt.err (!%p3483_p9)
}
  0x33   : > { %s3487_s26 = scalar_lea.vmem %s128_s29, 320  ;;  %p3495_p8 = scmp.lt.s32.totalorder %s128_s29, %s128_s29 }
  0x34   : > { %p3488_p10 = scmp.ne.s32.totalorder %s128_s29, %s3487_s26  ;;  %p3496_p6 = scmp.lt.s32.totalorder %s3487_s26, %s3487_s26 }
  0x36   : > { %p3490_p12 = pnand %p3488_p10, %p3476_p3  ;;  %p3497_p13 = por %p3496_p6, %p3495_p8 }
  0x38   : > { %p3491_p0 = pneg %p3490_p12 }
  0x3a   : > { %p3498_p11 = pnand %p3497_p13, %p3491_p0 }
  0x3c   : > { %3501 = shalt.err (!%p3498_p11)
}
  0x3d   : > { %s3621_s5 = smov 64   ;;  %s3622_s6 = smov 4  }
  0x3e   : > { %3352 = dma.hbm_to_vmem [thread:$0]  (!%p3766_p1), %s4991_s1, 320, %s128_s29, [#allocation6], %s3621_s5, %s3621_s5, %s3622_s6  }
  0x3f   : > { %p4992_p2 = scmp.ne.s32.totalorder %s4988_s10, 0 }
  0x40   : > { %p4993_p4 = scmp.ne.s32.totalorder (!%p4992_p2), %s4989_s11, 0 }
  0x41   : > { %146 = sbr.rel (%p4992_p2) target bundleno = 891 (0x37b), region = 28 }
  0x48   : > { %3571 = dma.done.wait (%p4993_p4), [#allocation6], 320  }
  0x49   : > { %3573 = vsyncadd (%p4993_p4), [#allocation6], 4294966976  ;;  %s4972_s26 = sand.u32 1, %s3586_s13   ;;  %p167_p6 = scmp.lt.s32.totalorder %s3594_s15, 0 }
  0x4a   : > { %s3239_s29 = sshll.u32 %s4972_s26, 6  ;;  %s168_s30 = ssub.s32 0, %s3594_s15 }
  0x4b   : > { %s3240_s10 = smin.u32 %s3594_s15, %s168_s30  ;;  %p3359_p8 = scmp.eq.s32.totalorder %s3594_s15, 0 }
  0x4c   : > { %s170_s22 = sand.u32 1, %s3240_s10   ;;  %s3802_s5 = scalar_lea.vmem [#allocation8], %s3239_s29 }
  0x4d   : > { %s171_s27 = ssub.s32 0, %s170_s22 }
  0x4e   : > { %s5020_s27 = smov (!%p167_p6, %s171_s27), %s170_s22 }
  0x4f   : > { %p3242_p11 = scmp.lt.s32.totalorder %s5020_s27, 0  ;;  %s177_s11 = sadd.s32 2, %s5020_s27 }
  0x51   : > { %s5022_s11 = smov (!%p3242_p11, %s177_s11), %s5020_s27 }
  0x52   : > { %s3245_s6 = sshll.u32 %s3598_s16, 12  ;;  %s4973_s8 = smul.u32 138, %s3602_s17 }
  0x53   : > { %s185_s9 = sshra.s32 %s3245_s6, 7  ;;  %s3623_s10 = smov [#allocation2]  }
  0x54   : > { %s188_s30 = sadd.s32 %s4973_s8, %s185_s9  ;;  %s203_s22 = sshll.u32 %s3623_s10, 4  ;;  %s204_s22 = int_to_ptr.vmem [resolvable:$true] %s203_s22 }
  0x55   : > { %s3246_s27 = sshll.u32 %s188_s30, 6  ;;  %s3624_s26 = smov 64  }
  0x56   : > { %s3330_s29 = scalar_select %p3359_p8, [#allocation0], [#allocation13] }
  0x57   : > { %3331 = sst [smem:[#allocation10]] (%p3359_p8), %s3624_s26  ;;  %s3625_s1 = smov 128  }
  0x58   : > { %s195_s28 = sld [smem:[%s3330_s29]]   ;;  %s3626_s6 = smov 2  }
  0x59   : > { %3332 = sst [smem:[#allocation10 + $0x1]] (%p3359_p8), %s3625_s1  ;;  %s190_s10 = scalar_lea.hbm %s4963_s0, %s3246_s27 }
  0x5a   : > { %3333 = sst [smem:[#allocation10 + $0x2]] (%p3359_p8), %s3626_s6  ;;  %s3627_s25 = smov 4416  }
  0x5b   : > { %3334 = sst [smem:[#allocation10 + $0x3]] (%p3359_p8), %s3627_s25  ;;  %s3628_s30 = smov 4  }
  0x5c   : > { %3335 = sst [smem:[#allocation10 + $0x4]] (%p3359_p8), %s3624_s26  ;;  %s3629_s20 = smov [#allocation4]  }
  0x5d   : > { %3336 = sst [smem:[#allocation10 + $0x5]] (%p3359_p8), %s3628_s30  ;;  %s3630_s19 = smov [#allocation9]  }
  0x5e   : > { %s3247_s24 = sshll.u32 %s195_s28, 26  ;;  %s4994_s1 = sshll.u32 %s3598_s16, 1 }
  0x5f   : > { %s3248_s29 = sadd.s32 134217728, %s3247_s24  ;;  %s3830_s8 = sadd.s32 %s3594_s15, %s4994_s1 }
  0x60   : > { %3337 = dma.general (%p3359_p8), %s190_s10, 2688, %s204_s22, %s3629_s20, %s3630_s19, [#allocation10], %s3248_s29, 0  }
  0x61   : > { %s3313_s27 = smul.u32 168, %s5022_s11  ;;  %s225_s26 = scalar_lea.sflag [#allocation4], %s5022_s11 }
  0x63   : > { %s3833_s25 = scalar_lea.vmem [#allocation2], %s3313_s27 }
  0x64   : > { %3574 = dma.done.wait %s225_s26, 2688 }
  0x65   : > { %3575 = vsyncadd %s225_s26, 4294964608  ;;  %s230_s28 = sadd.s32 1, %s3594_s15 }
  0x66   : > { %p3837_p13 = scmp.lt.s32.totalorder %s230_s28, 2 }
  0x67   : > { %s236_s16 = ssub.s32 1, %s5022_s11  ;;  %s3314_s19 = sshll.u32 %s3830_s8, 11  ;;  %v3640_v5 = vmov 0   ;;  %vm401_vm0 = vcmask 1039360   ;;  %vm546_vm1 = vcmask 1031168   ;;  %vm691_vm2 = vcmask 1022976  }
  0x68   : > { %s3315_s20 = sadd.s32 2048, %s3314_s19  ;;  %s3316_s22 = smul.u32 168, %s236_s16  ;;  %962 = vmatprep.mubr.bf16.mxu0 %v3640_v5  ;;  %1003 = vmatprep.mubr.bf16.mxu1 %v3640_v5  ;;  %vm836_vm3 = vcmask 1014784   ;;  %vm926_vm4 = vcmask 654336  }
  0x69   : > { %s238_s6 = sshra.s32 %s3315_s20, 7  ;;  %s4996_s9 = smul.u32 138, %s3602_s17  ;;  %3464 = vset.pattern.permute.xlu0 %v3640_v5 }
  0x6a   : > { %s246_s27 = scalar_lea.vmem [#allocation2], %s3316_s22  ;;  %s3631_s18 = smov 64  }
  0x6b   : > { %s241_s10 = sadd.s32 %s238_s6, %s4996_s9  ;;  %s260_s26 = sshll.u32 %s246_s27, 4  ;;  %s261_s26 = int_to_ptr.vmem [resolvable:$true] %s260_s26 }
  0x6c   : > { %s3252_s15 = sshll.u32 %s241_s10, 6  ;;  %3340 = sst [smem:[#allocation12]] (%p3837_p13), %s3631_s18 }
  0x6d   : > { %s243_s1 = scalar_lea.hbm %s4963_s0, %s3252_s15  ;;  %s3632_s19 = smov 128  }
  0x6e   : > { %s3339_s28 = scalar_select %p3837_p13, [#allocation0], [#allocation14] }
  0x6f   : > { %3341 = sst [smem:[#allocation12 + $0x1]] (%p3837_p13), %s3632_s19  ;;  %s3633_s20 = smov 2  }
  0x70   : > { %s252_s11 = sld [smem:[%s3339_s28]]   ;;  %s3634_s6 = smov 4416  }
  0x71   : > { %3342 = sst [smem:[#allocation12 + $0x2]] (%p3837_p13), %s3633_s20  ;;  %s3635_s22 = smov 4  }
  0x72   : > { %3343 = sst [smem:[#allocation12 + $0x3]] (%p3837_p13), %s3634_s6  ;;  %s247_s15 = scalar_lea.sflag [#allocation4], %s236_s16 }
  0x73   : > { %3344 = sst [smem:[#allocation12 + $0x4]] (%p3837_p13), %s3631_s18  ;;  %s3636_s30 = smov [#allocation11]  }
  0x74   : > { %3345 = sst [smem:[#allocation12 + $0x5]] (%p3837_p13), %s3635_s22  ;;  %s3637_s29 = smov 127  }
  0x75   : > { %s3638_s18 = smov 126   ;;  %s3639_s24 = smov 125  }
  0x76   : > { %s3254_s9 = sshll.u32 %s252_s11, 26  ;;  %s3641_s16 = smov 124  }
  0x77   : > { %s3255_s10 = sadd.s32 134217728, %s3254_s9  ;;  %s4997_s6 = sand.u32 1, %s3586_s13  }
  0x78   : > { %3346 = dma.general (%p3837_p13), %s243_s1, 2688, %s261_s26, %s247_s15, %s3636_s30, [#allocation12], %s3255_s10, 0  }
  0x79   : > { %v3865_v0 = vld [vmem:[%s3833_s25 + $0x20] sm:$0xff]  ;;  %v3868_v1 = vld [vmem:[%s3833_s25 + $0x10] sm:$0xff]  ;;  %v3875_v2 = vld [vmem:[%s3833_s25 + $0x28] sm:$0xff]  ;;  %s3307_s26 = sshll.u32 %s3602_s17, 6  ;;  %s3105_s22 = scalar_lea.sflag [#allocation7], %s4997_s6 }
  0x7a   : > { %367 = vrot.lane.b32.xlu1 %v3865_v0, %s3637_s29  ;;  %363 = vrot.lane.b32.xlu0 %v3868_v1, %s3637_s29  ;;  %v3878_v3 = vld [vmem:[%s3833_s25 + $0x18] sm:$0xff]  ;;  %v3881_v4 = vld [vmem:[%s3833_s25 + $0x8] sm:$0xff]  ;;  %p4998_p3 = scmp.ne.s32.totalorder %s4985_s4, 0  ;;  %s3642_s10 = smov [#allocation8]  }
  0x7b   : > { %971 = vmatprep.subr.bf16.mxu1 %v3865_v0  ;;  %930 = vmatprep.subr.bf16.mxu0 %v3868_v1  ;;  %v3927_v6 = vld [vmem:[%s3833_s25] sm:$0xff]  ;;  %v3938_v7 = vld [vmem:[%s3833_s25 + $0x30] sm:$0xff]  ;;  %v3949_v8 = vld [vmem:[%s3833_s25 + $0x38] sm:$0xff]  ;;  %s3506_s15 = sshll.u32 %s3642_s10, 4  ;;  %s3507_s15 = int_to_ptr.vmem [resolvable:$false] %s3506_s15 }
  0x7c   : > { %972 = vmatpush1.bf16.msra.mxu1 %v3878_v3  ;;  %931 = vmatpush1.bf16.msra.mxu0 %v3881_v4  ;;  %v3960_v9 = vld [vmem:[%s3833_s25 + $0x40] sm:$0xff]  ;;  %v3971_v10 = vld [vmem:[%s3833_s25 + $0x48] sm:$0xff]  ;;  %v3982_v11 = vld [vmem:[%s3833_s25 + $0x50] sm:$0xff]  ;;  %s3508_s30 = scalar_lea.vmem %s3507_s15, 2048 }
  0x7d   : > { %v3993_v12 = vld [vmem:[%s3833_s25 + $0x58] sm:$0xff]  ;;  %v4004_v13 = vld [vmem:[%s3833_s25 + $0x60] sm:$0xff]  ;;  %v4015_v14 = vld [vmem:[%s3833_s25 + $0x68] sm:$0xff] }
  0x7e   : > { %369 = vrot.lane.b32.xlu1 %v3875_v2, %s3637_s29  ;;  %365 = vrot.lane.b32.xlu0 %v3878_v3, %s3637_s29  ;;  %v4026_v15 = vld [vmem:[%s3833_s25 + $0x70] sm:$0xff]  ;;  %v332_v36 = vld [vmem:[%s3833_s25 + $0x78] sm:$0xff] }
  0x7f   : > { %v920_v53 = vld [vmem:[#allocation5 + $0x4] sm:$0xf]  ;;  %v333_v54 = vld [vmem:[%s3833_s25 + $0x80] sm:$0xff] }
  0x80   : > { %v334_v58 = vld [vmem:[%s3833_s25 + $0x88] sm:$0xff]  ;;  %v335_v63 = vld [vmem:[%s3833_s25 + $0x90] sm:$0xff] }
  0x82   : > { %508 = vrot.lane.b32.xlu1 %v3868_v1, %s3638_s18  ;;  %361 = vrot.lane.b32.xlu0 %v3881_v4, %s3637_s29 }
  0x86   : > { %512 = vrot.lane.b32.xlu1 %v3865_v0, %s3638_s18  ;;  %510 = vrot.lane.b32.xlu0 %v3878_v3, %s3638_s18 }
  0x8a   : > { %506 = vrot.lane.b32.xlu1 %v3881_v4, %s3638_s18  ;;  %514 = vrot.lane.b32.xlu0 %v3875_v2, %s3638_s18 }
  0x8e   : > { %655 = vrot.lane.b32.xlu1 %v3878_v3, %s3639_s24  ;;  %653 = vrot.lane.b32.xlu0 %v3868_v1, %s3639_s24 }
  0x92   : > { %659 = vrot.lane.b32.xlu1 %v3875_v2, %s3639_s24  ;;  %657 = vrot.lane.b32.xlu0 %v3865_v0, %s3639_s24 }
  0x96   : > { %798 = vrot.lane.b32.xlu1 %v3868_v1, %s3641_s16  ;;  %651 = vrot.lane.b32.xlu0 %v3881_v4, %s3639_s24 }
  0x9a   : > { %802 = vrot.lane.b32.xlu1 %v3865_v0, %s3641_s16  ;;  %800 = vrot.lane.b32.xlu0 %v3878_v3, %s3641_s16 }
  0x9e   : > { %796 = vrot.lane.b32.xlu1 %v3881_v4, %s3641_s16  ;;  %804 = vrot.lane.b32.xlu0 %v3875_v2, %s3641_s16 }
  0xa2   : > { %504 = vrot.lane.b32.xlu1 %v3927_v6, %s3638_s18  ;;  %359 = vrot.lane.b32.xlu0 %v3927_v6, %s3637_s29 }
  0xa6   : > { %794 = vrot.lane.b32.xlu1 %v3927_v6, %s3641_s16  ;;  %649 = vrot.lane.b32.xlu0 %v3927_v6, %s3639_s24 }
  0xaa   : > { %516 = vrot.lane.b32.xlu1 %v3938_v7, %s3638_s18  ;;  %371 = vrot.lane.b32.xlu0 %v3938_v7, %s3637_s29 }
  0xae   : > { %806 = vrot.lane.b32.xlu1 %v3938_v7, %s3641_s16  ;;  %661 = vrot.lane.b32.xlu0 %v3938_v7, %s3639_s24 }
  0xb2   : > { %373 = vrot.lane.b32.xlu0 %v3949_v8, %s3637_s29  ;;  %518 = vrot.lane.b32.xlu1 %v3949_v8, %s3638_s18 }
  0xb6   : > { %663 = vrot.lane.b32.xlu0 %v3949_v8, %s3639_s24  ;;  %808 = vrot.lane.b32.xlu1 %v3949_v8, %s3641_s16 }
  0xba   : > { %375 = vrot.lane.b32.xlu0 %v3960_v9, %s3637_s29  ;;  %520 = vrot.lane.b32.xlu1 %v3960_v9, %s3638_s18 }
  0xbe   : > { %665 = vrot.lane.b32.xlu0 %v3960_v9, %s3639_s24  ;;  %810 = vrot.lane.b32.xlu1 %v3960_v9, %s3641_s16 }
  0xc2   : > { %377 = vrot.lane.b32.xlu0 %v3971_v10, %s3637_s29  ;;  %522 = vrot.lane.b32.xlu1 %v3971_v10, %s3638_s18 }
  0xc6   : > { %667 = vrot.lane.b32.xlu0 %v3971_v10, %s3639_s24  ;;  %812 = vrot.lane.b32.xlu1 %v3971_v10, %s3641_s16 }
  0xca   : > { %379 = vrot.lane.b32.xlu0 %v3982_v11, %s3637_s29  ;;  %524 = vrot.lane.b32.xlu1 %v3982_v11, %s3638_s18 }
  0xce   : > { %669 = vrot.lane.b32.xlu0 %v3982_v11, %s3639_s24  ;;  %814 = vrot.lane.b32.xlu1 %v3982_v11, %s3641_s16 }
  0xd2   : > { %381 = vrot.lane.b32.xlu0 %v3993_v12, %s3637_s29  ;;  %526 = vrot.lane.b32.xlu1 %v3993_v12, %s3638_s18 }
  0xd6   : > { %671 = vrot.lane.b32.xlu0 %v3993_v12, %s3639_s24  ;;  %816 = vrot.lane.b32.xlu1 %v3993_v12, %s3641_s16 }
  0xda   : > { %383 = vrot.lane.b32.xlu0 %v4004_v13, %s3637_s29  ;;  %528 = vrot.lane.b32.xlu1 %v4004_v13, %s3638_s18 }
  0xde   : > { %673 = vrot.lane.b32.xlu0 %v4004_v13, %s3639_s24  ;;  %818 = vrot.lane.b32.xlu1 %v4004_v13, %s3641_s16 }
  0xe2   : > { %385 = vrot.lane.b32.xlu0 %v4015_v14, %s3637_s29  ;;  %530 = vrot.lane.b32.xlu1 %v4015_v14, %s3638_s18 }
  0xe6   : > { %675 = vrot.lane.b32.xlu0 %v4015_v14, %s3639_s24  ;;  %820 = vrot.lane.b32.xlu1 %v4015_v14, %s3641_s16 }
  0xea   : > { %387 = vrot.lane.b32.xlu0 %v4026_v15, %s3637_s29  ;;  %532 = vrot.lane.b32.xlu1 %v4026_v15, %s3638_s18 }
  0xec   : > { %v368_v16 = vpop.permute.xlu1 %367  ;;  %v364_v17 = vpop.permute.xlu0 %363 }
  0xee   : > { %677 = vrot.lane.b32.xlu0 %v4026_v15, %s3639_s24  ;;  %822 = vrot.lane.b32.xlu1 %v4026_v15, %s3641_s16 }
  0xf0   : > { %v4036_v18 = vpop.permute.xlu1 %369  ;;  %v366_v19 = vpop.permute.xlu0 %365 }
  0xf1   : > { %v4040_v20 = vsel %vm401_vm0, %v368_v16, %v4036_v18  ;;  %v4043_v21 = vsel %vm401_vm0, %v366_v19, %v368_v16  ;;  %v4046_v22 = vsel %vm401_vm0, %v364_v17, %v366_v19 }
  0xf2   : > { %932 = vmatprep.subr.bf16.mxu0 %v4046_v22  ;;  %973 = vmatprep.subr.bf16.mxu1 %v4040_v20 }
  0xf3   : > { %974 = vmatpush1.bf16.msra.mxu1 %v4043_v21  ;;  %389 = vrot.lane.b32.xlu0 %v332_v36, %s3637_s29 }
  0xf4   : > { %v509_v23 = vpop.permute.xlu1 %508  ;;  %v4051_v24 = vpop.permute.xlu0 %361  ;;  %534 = vrot.lane.b32.xlu1 %v332_v36, %s3638_s18 }
  0xf5   : > { %v403_v25 = vsel %vm401_vm0, %v4051_v24, %v364_v17  ;;  %v336_v17 = vld [vmem:[%s3833_s25 + $0x98] sm:$0xff] }
  0xf6   : > { %933 = vmatpush1.bf16.msra.mxu0 %v403_v25 }
  0xf7   : > { %679 = vrot.lane.b32.xlu0 %v332_v36, %s3639_s24 }
  0xf8   : > { %v513_v26 = vpop.permute.xlu1 %512  ;;  %v511_v27 = vpop.permute.xlu0 %510  ;;  %824 = vrot.lane.b32.xlu1 %v332_v36, %s3641_s16 }
  0xf9   : > { %v4056_v28 = vsel %vm546_vm1, %v509_v23, %v511_v27  ;;  %v4070_v33 = vsel %vm546_vm1, %v511_v27, %v513_v26  ;;  %v1098_v27 = vld [vmem:[#allocation5 + $0x8] sm:$0xf] }
  0xfa   : > { %934 = vmatprep.subr.bf16.mxu0 %v4056_v28 }
  0xfb   : > { %391 = vrot.lane.b32.xlu0 %v333_v54, %s3637_s29 }
  0xfc   : > { %v4059_v29 = vpop.permute.xlu1 %506  ;;  %v4061_v30 = vpop.permute.xlu0 %514  ;;  %536 = vrot.lane.b32.xlu1 %v333_v54, %s3638_s18 }
  0xfd   : > { %v4065_v31 = vsel %vm546_vm1, %v513_v26, %v4061_v30  ;;  %v548_v32 = vsel %vm546_vm1, %v4059_v29, %v509_v23 }
  0xfe   : > { %935 = vmatpush1.bf16.msra.mxu0 %v548_v32  ;;  %975 = vmatprep.subr.bf16.mxu1 %v4065_v31 }
  0xff   : > { %976 = vmatpush1.bf16.msra.mxu1 %v4070_v33  ;;  %681 = vrot.lane.b32.xlu0 %v333_v54, %s3639_s24 }
 0x100   : > { %v656_v34 = vpop.permute.xlu1 %655  ;;  %v654_v35 = vpop.permute.xlu0 %653  ;;  %826 = vrot.lane.b32.xlu1 %v333_v54, %s3641_s16 }
 0x101   : > { %v4076_v37 = vsel %vm691_vm2, %v654_v35, %v656_v34 }
 0x102   : > { %936 = vmatprep.subr.bf16.mxu0 %v4076_v37 }
 0x103   : > { %393 = vrot.lane.b32.xlu0 %v334_v58, %s3637_s29 }
 0x104   : > { %v4081_v38 = vpop.permute.xlu1 %659  ;;  %v658_v39 = vpop.permute.xlu0 %657  ;;  %538 = vrot.lane.b32.xlu1 %v334_v58, %s3638_s18 }
 0x105   : > { %v4084_v40 = vsel %vm691_vm2, %v656_v34, %v658_v39  ;;  %v4088_v41 = vsel %vm691_vm2, %v658_v39, %v4081_v38 }
 0x106   : > { %977 = vmatprep.subr.bf16.mxu1 %v4088_v41 }
 0x107   : > { %978 = vmatpush1.bf16.msra.mxu1 %v4084_v40  ;;  %683 = vrot.lane.b32.xlu0 %v334_v58, %s3639_s24 }
 0x108   : > { %v799_v42 = vpop.permute.xlu1 %798  ;;  %v652_v43 = vpop.permute.xlu0 %651  ;;  %828 = vrot.lane.b32.xlu1 %v334_v58, %s3641_s16 }
 0x109   : > { %v693_v44 = vsel %vm691_vm2, %v652_v43, %v654_v35 }
 0x10a   : > { %937 = vmatpush1.bf16.msra.mxu0 %v693_v44 }
 0x10b   : > { %395 = vrot.lane.b32.xlu0 %v335_v63, %s3637_s29 }
 0x10c   : > { %v803_v45 = vpop.permute.xlu1 %802  ;;  %v801_v46 = vpop.permute.xlu0 %800  ;;  %540 = vrot.lane.b32.xlu1 %v335_v63, %s3638_s18 }
 0x10d   : > { %v4096_v47 = vsel %vm836_vm3, %v799_v42, %v801_v46  ;;  %v4107_v52 = vsel %vm836_vm3, %v801_v46, %v803_v45  ;;  %v1320_v46 = vld [vmem:[#allocation5 + $0x10] sm:$0xf] }
 0x10e   : > { %938 = vmatprep.subr.bf16.mxu0 %v4096_v47 }
 0x10f   : > { %685 = vrot.lane.b32.xlu0 %v335_v63, %s3639_s24 }
 0x110   : > { %v797_v48 = vpop.permute.xlu1 %796  ;;  %v4099_v49 = vpop.permute.xlu0 %804  ;;  %830 = vrot.lane.b32.xlu1 %v335_v63, %s3641_s16 }
 0x111   : > { %v4103_v50 = vsel %vm836_vm3, %v803_v45, %v4099_v49  ;;  %v838_v51 = vsel %vm836_vm3, %v797_v48, %v799_v42 }
 0x112   : > { %939 = vmatpush1.bf16.msra.mxu0 %v838_v51  ;;  %979 = vmatprep.subr.bf16.mxu1 %v4103_v50 }
 0x113   : > { %980 = vmatpush1.bf16.msra.mxu1 %v4107_v52  ;;  %1015 = vmatprep.subr.bf16.mxu0 %v3881_v4 }
 0x114   : > { %1056 = vmatprep.subr.bf16.mxu1 %v3878_v3  ;;  %v360_v55 = vpop.permute.xlu0 %359  ;;  %v505_v57 = vpop.permute.xlu1 %504  ;;  %397 = vrot.lane.b32.xlu0 %v336_v17, %s3637_s29 }
 0x115   : > { %3256 = vmatmul.mubr.msk.bf16.vlgmr.msra.gmra.mrb[0].mxu0 %vm926_vm4, %v920_v53  ;;  %v402_v56 = vsel %vm401_vm0, %v360_v55, %v4051_v24  ;;  %v547_v59 = vsel %vm546_vm1, %v505_v57, %v4059_v29  ;;  %v337_v24 = vld [vmem:[%s3833_s25 + $0xa0] sm:$0xff]  ;;  %542 = vrot.lane.b32.xlu1 %v336_v17, %s3638_s18 }
 0x116   : > { %3257 = vmatmul.mubr.msk.bf16.vlgmr.msra.gmra.mrb[0].mxu1 %vm926_vm4, %v920_v53  ;;  %1016 = vmatpush1.bf16.msra.mxu0 %v3927_v6  ;;  %v898_v6 = vld [vmem:[#allocation5] sm:$0xf] }
 0x117   : > { %1017 = vmatprep.subr.bf16.mxu0 %v403_v25  ;;  %1057 = vmatpush1.bf16.msra.mxu1 %v3868_v1 }
 0x118   : > { %1058 = vmatprep.subr.bf16.mxu1 %v4043_v21  ;;  %1047 = vmatprep.mubr.bf16.mxu0 %v3640_v5  ;;  %v650_v60 = vpop.permute.xlu0 %649  ;;  %v795_v62 = vpop.permute.xlu1 %794 }
 0x119   : > { %1088 = vmatprep.mubr.bf16.mxu1 %v3640_v5  ;;  %v692_v61 = vsel %vm691_vm2, %v650_v60, %v652_v43  ;;  %v837_v4 = vsel %vm836_vm3, %v795_v62, %v797_v48  ;;  %687 = vrot.lane.b32.xlu0 %v336_v17, %s3639_s24 }
 0x11a   : > { %1018 = vmatpush1.bf16.msra.mxu0 %v402_v56  ;;  %832 = vrot.lane.b32.xlu1 %v336_v17, %s3641_s16  ;;  %v1478_v56 = vld [vmem:[#allocation5 + $0x4] sm:$0xf] }
 0x11b   : > { %1019 = vmatprep.subr.bf16.mxu0 %v548_v32  ;;  %1059 = vmatpush1.bf16.msra.mxu1 %v4046_v22 }
 0x11c   : > { %1060 = vmatprep.subr.bf16.mxu1 %v4070_v33  ;;  %v372_v16 = vpop.permute.xlu0 %371  ;;  %v517_v23 = vpop.permute.xlu1 %516 }
 0x11d   : > { %v4155_v19 = vsel %vm401_vm0, %v4036_v18, %v372_v16  ;;  %399 = vrot.lane.b32.xlu0 %v337_v24, %s3637_s29 }
 0x11e   : > { %1020 = vmatpush1.bf16.msra.mxu0 %v547_v59  ;;  %544 = vrot.lane.b32.xlu1 %v337_v24, %s3638_s18 }
 0x11f   : > { %1021 = vmatprep.subr.bf16.mxu0 %v693_v44  ;;  %1061 = vmatpush1.bf16.msra.mxu1 %v4056_v28 }
 0x120   : > { %1062 = vmatprep.subr.bf16.mxu1 %v4084_v40  ;;  %v662_v18 = vpop.permute.xlu0 %661  ;;  %v807_v25 = vpop.permute.xlu1 %806 }
 0x121   : > { %v4188_v26 = vsel %vm836_vm3, %v4099_v49, %v807_v25  ;;  %689 = vrot.lane.b32.xlu0 %v337_v24, %s3639_s24 }
 0x122   : > { %1022 = vmatpush1.bf16.msra.mxu0 %v692_v61  ;;  %834 = vrot.lane.b32.xlu1 %v337_v24, %s3641_s16  ;;  %v1654_v61 = vld [vmem:[#allocation5 + $0x8] sm:$0xf]  ;;  %v1764_v24 = vld [vmem:[#allocation5 + $0xc] sm:$0xf] }
 0x123   : > { %1023 = vmatprep.subr.bf16.mxu0 %v838_v51  ;;  %1063 = vmatpush1.bf16.msra.mxu1 %v4076_v37 }
 0x124   : > { %1064 = vmatprep.subr.bf16.mxu1 %v4107_v52  ;;  %v374_v29 = vpop.permute.xlu0 %373  ;;  %v519_v32 = vpop.permute.xlu1 %518 }
 0x126   : > { %1024 = vmatpush1.bf16.msra.mxu0 %v837_v4 }
 0x127   : > { %1065 = vmatpush1.bf16.msra.mxu1 %v4096_v47  ;;  %1122 = vmatprep.subr.bf16.mxu0 %v3878_v3 }
 0x128   : > { %1163 = vmatprep.subr.bf16.mxu1 %v3875_v2  ;;  %v664_v34 = vpop.permute.xlu0 %663 }
 0x129   : > { %3258 = vmatmul.mubr.msk.bf16.vlgmr.msra.gmra.mrb[4].mxu0 %vm926_vm4, %v898_v6  ;;  %v4223_v35 = vsel %vm691_vm2, %v662_v18, %v664_v34 }
 0x12a   : > { %3259 = vmatmul.mubr.msk.bf16.vlgmr.msra.gmra.mrb[4].mxu1 %vm926_vm4, %v898_v6  ;;  %1123 = vmatpush1.bf16.msra.mxu0 %v3868_v1  ;;  %v4167_v1 = vsel %vm546_vm1, %v4061_v30, %v517_v23  ;;  %v4206_v30 = vsel %vm401_vm0, %v372_v16, %v374_v29 }
 0x12b   : > { %1124 = vmatprep.subr.bf16.mxu0 %v4043_v21  ;;  %1164 = vmatpush1.bf16.msra.mxu1 %v3865_v0 }
 0x12c   : > { %1165 = vmatprep.subr.bf16.mxu1 %v4155_v19  ;;  %1154 = vmatprep.mubr.bf16.mxu0 %v3640_v5 }
 0x12d   : > { %1195 = vmatprep.mubr.bf16.mxu1 %v3640_v5 }
 0x12e   : > { %1125 = vmatpush1.bf16.msra.mxu0 %v4046_v22  ;;  %v4178_v22 = vsel %vm691_vm2, %v4081_v38, %v662_v18 }
 0x12f   : > { %1126 = vmatprep.subr.bf16.mxu0 %v4070_v33  ;;  %1166 = vmatpush1.bf16.msra.mxu1 %v4040_v20 }
 0x130   : > { %1167 = vmatprep.subr.bf16.mxu1 %v4167_v1 }
 0x132   : > { %1127 = vmatpush1.bf16.msra.mxu0 %v4056_v28  ;;  %v897_v28 = vld [vmem:[%s4965_s2] sm:$0xff] }
 0x133   : > { %1128 = vmatprep.subr.bf16.mxu0 %v4084_v40  ;;  %1168 = vmatpush1.bf16.msra.mxu1 %v4065_v31 }
 0x134   : > { %1169 = vmatprep.subr.bf16.mxu1 %v4178_v22  ;;  %1432 = vperm.xlu0 %3464, %v897_v28  }
 0x136   : > { %1129 = vmatpush1.bf16.msra.mxu0 %v4076_v37  ;;  %v376_v37 = vpop.permute.xlu0 %375 }
 0x137   : > { %1130 = vmatprep.subr.bf16.mxu0 %v4107_v52  ;;  %1170 = vmatpush1.bf16.msra.mxu1 %v4088_v41  ;;  %v4243_v38 = vsel %vm401_vm0, %v374_v29, %v376_v37 }
 0x138   : > { %1171 = vmatprep.subr.bf16.mxu1 %v4188_v26 }
 0x13a   : > { %1131 = vmatpush1.bf16.msra.mxu0 %v4096_v47  ;;  %v666_v42 = vpop.permute.xlu0 %665 }
 0x13b   : > { %1172 = vmatpush1.bf16.msra.mxu1 %v4103_v50  ;;  %1233 = vmatprep.subr.bf16.mxu0 %v3865_v0  ;;  %v4259_v43 = vsel %vm691_vm2, %v664_v34, %v666_v42 }
 0x13c   : > { %1274 = vmatprep.subr.bf16.mxu1 %v3938_v7 }
 0x13d   : > { %3260 = vmatmul.mubr.msk.bf16.vlgmr.msra.gmra.mrb[8].mxu0 %vm926_vm4, %v1098_v27 }
 0x13e   : > { %3261 = vmatmul.mubr.msk.bf16.vlgmr.msra.gmra.mrb[8].mxu1 %vm926_vm4, %v1098_v27  ;;  %1234 = vmatpush1.bf16.msra.mxu0 %v3878_v3  ;;  %v4216_v3 = vsel %vm546_vm1, %v517_v23, %v519_v32  ;;  %v4274_v47 = vpop.permute.xlu0 %377 }
 0x13f   : > { %1235 = vmatprep.subr.bf16.mxu0 %v4040_v20  ;;  %1275 = vmatpush1.bf16.msra.mxu1 %v3875_v2  ;;  %v4282_v48 = vsel %vm401_vm0, %v376_v37, %v4274_v47 }
 0x140   : > { %1276 = vmatprep.subr.bf16.mxu1 %v4206_v30  ;;  %1265 = vmatprep.mubr.bf16.mxu0 %v3640_v5 }
 0x141   : > { %1306 = vmatprep.mubr.bf16.mxu1 %v3640_v5 }
 0x142   : > { %1236 = vmatpush1.bf16.msra.mxu0 %v4043_v21  ;;  %v809_v21 = vpop.permute.xlu1 %808 }
 0x143   : > { %1237 = vmatprep.subr.bf16.mxu0 %v4065_v31  ;;  %1277 = vmatpush1.bf16.msra.mxu1 %v4155_v19  ;;  %v4230_v36 = vsel %vm836_vm3, %v807_v25, %v809_v21 }
 0x144   : > { %1278 = vmatprep.subr.bf16.mxu1 %v4216_v3 }
 0x146   : > { %1238 = vmatpush1.bf16.msra.mxu0 %v4070_v33  ;;  %v1209_v33 = vld [vmem:[#allocation5 + $0xc] sm:$0xf]  ;;  %v521_v39 = vpop.permute.xlu1 %520 }
 0x147   : > { %1239 = vmatprep.subr.bf16.mxu0 %v4088_v41  ;;  %1279 = vmatpush1.bf16.msra.mxu1 %v4167_v1 }
 0x148   : > { %1280 = vmatprep.subr.bf16.mxu1 %v4223_v35 }
 0x14a   : > { %1240 = vmatpush1.bf16.msra.mxu0 %v4084_v40  ;;  %v4252_v40 = vsel %vm546_vm1, %v519_v32, %v521_v39  ;;  %v811_v44 = vpop.permute.xlu1 %810 }
 0x14b   : > { %1241 = vmatprep.subr.bf16.mxu0 %v4103_v50  ;;  %1281 = vmatpush1.bf16.msra.mxu1 %v4178_v22  ;;  %v4266_v45 = vsel %vm836_vm3, %v809_v21, %v811_v44  ;;  %v1874_v21 = vld [vmem:[#allocation5 + $0x10] sm:$0xf] }
 0x14c   : > { %1282 = vmatprep.subr.bf16.mxu1 %v4230_v36 }
 0x14e   : > { %1242 = vmatpush1.bf16.msra.mxu0 %v4107_v52  ;;  %v4286_v49 = vpop.permute.xlu1 %522  ;;  %v668_v52 = vpop.permute.xlu0 %667 }
 0x14f   : > { %1283 = vmatpush1.bf16.msra.mxu1 %v4188_v26  ;;  %1344 = vmatprep.subr.bf16.mxu0 %v3875_v2  ;;  %v4294_v51 = vsel %vm546_vm1, %v521_v39, %v4286_v49  ;;  %v4301_v53 = vsel %vm691_vm2, %v666_v42, %v668_v52 }
 0x150   : > { %1385 = vmatprep.subr.bf16.mxu1 %v3949_v8 }
 0x151   : > { %3262 = vmatmul.mubr.msk.bf16.vlgmr.msra.gmra.mrb[12].mxu0 %vm926_vm4, %v1209_v33 }
 0x152   : > { %3263 = vmatmul.mubr.msk.bf16.vlgmr.msra.gmra.mrb[12].mxu1 %vm926_vm4, %v1209_v33  ;;  %1345 = vmatpush1.bf16.msra.mxu0 %v3865_v0  ;;  %v4305_v54 = vpop.permute.xlu1 %812 }
 0x153   : > { %1346 = vmatprep.subr.bf16.mxu0 %v4155_v19  ;;  %1386 = vmatpush1.bf16.msra.mxu1 %v3938_v7  ;;  %v4311_v55 = vsel %vm836_vm3, %v811_v44, %v4305_v54 }
 0x154   : > { %1387 = vmatprep.subr.bf16.mxu1 %v4243_v38  ;;  %1376 = vmatprep.mubr.bf16.mxu0 %v3640_v5 }
 0x155   : > { %1417 = vmatprep.mubr.bf16.mxu1 %v3640_v5 }
 0x156   : > { %1347 = vmatpush1.bf16.msra.mxu0 %v4040_v20 }
 0x157   : > { %1348 = vmatprep.subr.bf16.mxu0 %v4167_v1  ;;  %1388 = vmatpush1.bf16.msra.mxu1 %v4206_v30 }
 0x158   : > { %1389 = vmatprep.subr.bf16.mxu1 %v4252_v40 }
 0x15a   : > { %1349 = vmatpush1.bf16.msra.mxu0 %v4065_v31 }
 0x15b   : > { %1350 = vmatprep.subr.bf16.mxu0 %v4178_v22  ;;  %1390 = vmatpush1.bf16.msra.mxu1 %v4216_v3 }
 0x15c   : > { %1391 = vmatprep.subr.bf16.mxu1 %v4259_v43 }
 0x15e   : > { %1351 = vmatpush1.bf16.msra.mxu0 %v4088_v41 }
 0x15f   : > { %1352 = vmatprep.subr.bf16.mxu0 %v4188_v26  ;;  %1392 = vmatpush1.bf16.msra.mxu1 %v4223_v35 }
 0x160   : > { %1393 = vmatprep.subr.bf16.mxu1 %v4266_v45 }
 0x162   : > { %1353 = vmatpush1.bf16.msra.mxu0 %v4103_v50 }
 0x163   : > { %1394 = vmatpush1.bf16.msra.mxu1 %v4230_v36  ;;  %1487 = vmatprep.subr.bf16.mxu0 %v3938_v7 }
 0x164   : > { %1528 = vmatprep.subr.bf16.mxu1 %v3960_v9 }
 0x165   : > { %3264 = vmatmul.mubr.msk.bf16.vlgmr.msra.gmra.mrb[16].mxu0 %vm926_vm4, %v1320_v46 }
 0x166   : > { %3265 = vmatmul.mubr.msk.bf16.vlgmr.msra.gmra.mrb[16].mxu1 %vm926_vm4, %v1320_v46  ;;  %1488 = vmatpush1.bf16.msra.mxu0 %v3875_v2 }
 0x167   : > { %1489 = vmatprep.subr.bf16.mxu0 %v4206_v30  ;;  %1529 = vmatpush1.bf16.msra.mxu1 %v3949_v8 }
 0x168   : > { %1530 = vmatprep.subr.bf16.mxu1 %v4282_v48  ;;  %1519 = vmatprep.mubr.bf16.mxu0 %v3640_v5 }
 0x169   : > { %1560 = vmatprep.mubr.bf16.mxu1 %v3640_v5 }
 0x16a   : > { %1490 = vmatpush1.bf16.msra.mxu0 %v4155_v19 }
 0x16b   : > { %1491 = vmatprep.subr.bf16.mxu0 %v4216_v3  ;;  %1531 = vmatpush1.bf16.msra.mxu1 %v4243_v38 }
 0x16c   : > { %1532 = vmatprep.subr.bf16.mxu1 %v4294_v51 }
 0x16e   : > { %1492 = vmatpush1.bf16.msra.mxu0 %v4167_v1 }
 0x16f   : > { %1493 = vmatprep.subr.bf16.mxu0 %v4223_v35  ;;  %1533 = vmatpush1.bf16.msra.mxu1 %v4252_v40 }
 0x170   : > { %1534 = vmatprep.subr.bf16.mxu1 %v4301_v53 }
 0x172   : > { %1494 = vmatpush1.bf16.msra.mxu0 %v4178_v22 }
 0x173   : > { %1495 = vmatprep.subr.bf16.mxu0 %v4230_v36  ;;  %1535 = vmatpush1.bf16.msra.mxu1 %v4259_v43 }
 0x174   : > { %1536 = vmatprep.subr.bf16.mxu1 %v4311_v55 }
 0x176   : > { %1496 = vmatpush1.bf16.msra.mxu0 %v4188_v26 }
 0x177   : > { %1537 = vmatpush1.bf16.msra.mxu1 %v4266_v45  ;;  %1572 = vmatprep.subr.bf16.mxu0 %v3875_v2  ;;  %v380_v2 = vpop.permute.xlu0 %379 }
 0x178   : > { %1613 = vmatprep.subr.bf16.mxu1 %v3949_v8 }
 0x179   : > { %3268 = vmatmul.mubr.msk.bf16.vlgmr.msra.gmra.mrb[20].mxu0 %vm926_vm4, %v1478_v56 }
 0x17a   : > { %3269 = vmatmul.mubr.msk.bf16.vlgmr.msra.gmra.mrb[20].mxu1 %vm926_vm4, %v1478_v56  ;;  %1573 = vmatpush1.bf16.msra.mxu0 %v3865_v0  ;;  %v1457_v0 = vld [vmem:[#allocation5] sm:$0xf] }
 0x17b   : > { %1574 = vmatprep.subr.bf16.mxu0 %v4155_v19  ;;  %1614 = vmatpush1.bf16.msra.mxu1 %v3938_v7 }
 0x17c   : > { %1615 = vmatprep.subr.bf16.mxu1 %v4243_v38  ;;  %1604 = vmatprep.mubr.bf16.mxu0 %v3640_v5 }
 0x17d   : > { %1645 = vmatprep.mubr.bf16.mxu1 %v3640_v5 }
 0x17e   : > { %1575 = vmatpush1.bf16.msra.mxu0 %v4040_v20  ;;  %v4349_v20 = vsel %vm401_vm0, %v4274_v47, %v380_v2 }
 0x17f   : > { %1576 = vmatprep.subr.bf16.mxu0 %v4167_v1  ;;  %1616 = vmatpush1.bf16.msra.mxu1 %v4206_v30 }
 0x180   : > { %1617 = vmatprep.subr.bf16.mxu1 %v4252_v40 }
 0x182   : > { %1577 = vmatpush1.bf16.msra.mxu0 %v4065_v31  ;;  %v525_v31 = vpop.permute.xlu1 %524 }
 0x183   : > { %1578 = vmatprep.subr.bf16.mxu0 %v4178_v22  ;;  %1618 = vmatpush1.bf16.msra.mxu1 %v4216_v3 }
 0x184   : > { %1619 = vmatprep.subr.bf16.mxu1 %v4259_v43 }
 0x186   : > { %1579 = vmatpush1.bf16.msra.mxu0 %v4088_v41  ;;  %v670_v41 = vpop.permute.xlu0 %669  ;;  %v815_v57 = vpop.permute.xlu1 %814 }
 0x187   : > { %1580 = vmatprep.subr.bf16.mxu0 %v4188_v26  ;;  %1620 = vmatpush1.bf16.msra.mxu1 %v4223_v35  ;;  %v4374_v59 = vsel %vm836_vm3, %v4305_v54, %v815_v57 }
 0x188   : > { %1621 = vmatprep.subr.bf16.mxu1 %v4266_v45 }
 0x18a   : > { %1581 = vmatpush1.bf16.msra.mxu0 %v4103_v50  ;;  %v4366_v50 = vsel %vm691_vm2, %v668_v52, %v670_v41  ;;  %v382_v58 = vpop.permute.xlu0 %381  ;;  %v527_v4 = vpop.permute.xlu1 %526 }
 0x18b   : > { %1622 = vmatpush1.bf16.msra.mxu1 %v4230_v36  ;;  %1678 = vmatprep.subr.bf16.mxu0 %v3949_v8  ;;  %v4391_v63 = vsel %vm401_vm0, %v380_v2, %v382_v58 }
 0x18c   : > { %1719 = vmatprep.subr.bf16.mxu1 %v3971_v10 }
 0x18d   : > { %3270 = vmatmul.mubr.msk.bf16.vlgmr.msra.gmra.mrb[24].mxu0 %vm926_vm4, %v1457_v0 }
 0x18e   : > { %3271 = vmatmul.mubr.msk.bf16.vlgmr.msra.gmra.mrb[24].mxu1 %vm926_vm4, %v1457_v0  ;;  %1679 = vmatpush1.bf16.msra.mxu0 %v3938_v7  ;;  %v4359_v7 = vsel %vm546_vm1, %v4286_v49, %v525_v31  ;;  %v4378_v60 = vpop.permute.xlu0 %671  ;;  %v817_v19 = vpop.permute.xlu1 %816 }
 0x18f   : > { %1680 = vmatprep.subr.bf16.mxu0 %v4243_v38  ;;  %1720 = vmatpush1.bf16.msra.mxu1 %v3960_v9  ;;  %v4412_v17 = vsel %vm691_vm2, %v670_v41, %v4378_v60  ;;  %v4421_v1 = vsel %vm836_vm3, %v815_v57, %v817_v19 }
 0x190   : > { %1721 = vmatprep.subr.bf16.mxu1 %v4349_v20  ;;  %1710 = vmatprep.mubr.bf16.mxu0 %v3640_v5 }
 0x191   : > { %1751 = vmatprep.mubr.bf16.mxu1 %v3640_v5 }
 0x192   : > { %1681 = vmatpush1.bf16.msra.mxu0 %v4206_v30  ;;  %v4385_v62 = vpop.permute.xlu0 %383  ;;  %v529_v26 = vpop.permute.xlu1 %528 }
 0x193   : > { %1682 = vmatprep.subr.bf16.mxu0 %v4252_v40  ;;  %1722 = vmatpush1.bf16.msra.mxu1 %v4282_v48  ;;  %v4439_v25 = vsel %vm401_vm0, %v382_v58, %v4385_v62  ;;  %v4450_v28 = vsel %vm546_vm1, %v527_v4, %v529_v26 }
 0x194   : > { %1723 = vmatprep.subr.bf16.mxu1 %v4359_v7 }
 0x196   : > { %1683 = vmatpush1.bf16.msra.mxu0 %v4216_v3  ;;  %v4396_v6 = vpop.permute.xlu0 %673  ;;  %v819_v32 = vpop.permute.xlu1 %818 }
 0x197   : > { %1684 = vmatprep.subr.bf16.mxu0 %v4259_v43  ;;  %1724 = vmatpush1.bf16.msra.mxu1 %v4294_v51  ;;  %v4461_v30 = vsel %vm691_vm2, %v4378_v60, %v4396_v6  ;;  %v4470_v34 = vsel %vm836_vm3, %v817_v19, %v819_v32 }
 0x198   : > { %1725 = vmatprep.subr.bf16.mxu1 %v4366_v50 }
 0x19a   : > { %1685 = vmatpush1.bf16.msra.mxu0 %v4223_v35  ;;  %v4407_v16 = vpop.permute.xlu0 %385  ;;  %v4493_v37 = vpop.permute.xlu1 %530 }
 0x19b   : > { %1686 = vmatprep.subr.bf16.mxu0 %v4266_v45  ;;  %1726 = vmatpush1.bf16.msra.mxu1 %v4301_v53  ;;  %v4489_v33 = vsel %vm401_vm0, %v4385_v62, %v4407_v16  ;;  %v4503_v39 = vsel %vm546_vm1, %v529_v26, %v4493_v37 }
 0x19c   : > { %1727 = vmatprep.subr.bf16.mxu1 %v4374_v59 }
 0x19e   : > { %1687 = vmatpush1.bf16.msra.mxu0 %v4230_v36  ;;  %v4417_v23 = vpop.permute.xlu0 %675  ;;  %v4516_v42 = vpop.permute.xlu1 %820 }
 0x19f   : > { %1728 = vmatpush1.bf16.msra.mxu1 %v4311_v55  ;;  %1788 = vmatprep.subr.bf16.mxu0 %v3960_v9  ;;  %v4524_v44 = vsel %vm836_vm3, %v819_v32, %v4516_v42 }
 0x1a0   : > { %1829 = vmatprep.subr.bf16.mxu1 %v3982_v11 }
 0x1a1   : > { %3272 = vmatmul.mubr.msk.bf16.vlgmr.msra.gmra.mrb[28].mxu0 %vm926_vm4, %v1654_v61 }
 0x1a2   : > { %3273 = vmatmul.mubr.msk.bf16.vlgmr.msra.gmra.mrb[28].mxu1 %vm926_vm4, %v1654_v61  ;;  %1789 = vmatpush1.bf16.msra.mxu0 %v3949_v8  ;;  %v4402_v8 = vsel %vm546_vm1, %v525_v31, %v527_v4  ;;  %v4426_v18 = vpop.permute.xlu0 %387  ;;  %v2006_v31 = vld [vmem:[#allocation5] sm:$0xf] }
 0x1a3   : > { %1790 = vmatprep.subr.bf16.mxu0 %v4282_v48  ;;  %1830 = vmatpush1.bf16.msra.mxu1 %v3971_v10 }
 0x1a4   : > { %1831 = vmatprep.subr.bf16.mxu1 %v4391_v63  ;;  %1820 = vmatprep.mubr.bf16.mxu0 %v3640_v5 }
 0x1a5   : > { %1861 = vmatprep.mubr.bf16.mxu1 %v3640_v5 }
 0x1a6   : > { %1791 = vmatpush1.bf16.msra.mxu0 %v4243_v38  ;;  %v4432_v22 = vpop.permute.xlu0 %677 }
 0x1a7   : > { %1792 = vmatprep.subr.bf16.mxu0 %v4294_v51  ;;  %1832 = vmatpush1.bf16.msra.mxu1 %v4349_v20 }
 0x1a8   : > { %1833 = vmatprep.subr.bf16.mxu1 %v4402_v8 }
 0x1aa   : > { %1793 = vmatpush1.bf16.msra.mxu0 %v4252_v40  ;;  %v4445_v27 = vpop.permute.xlu0 %389  ;;  %v4512_v40 = vsel %vm691_vm2, %v4396_v6, %v4417_v23 }
 0x1ab   : > { %1794 = vmatprep.subr.bf16.mxu0 %v4301_v53  ;;  %1834 = vmatpush1.bf16.msra.mxu1 %v4359_v7  ;;  %v4618_v19 = vsel %vm401_vm0, %v4426_v18, %v4445_v27 }
 0x1ac   : > { %1835 = vmatprep.subr.bf16.mxu1 %v4412_v17 }
 0x1ae   : > { %1795 = vmatpush1.bf16.msra.mxu0 %v4259_v43  ;;  %v4455_v29 = vpop.permute.xlu0 %679 }
 0x1af   : > { %1796 = vmatprep.subr.bf16.mxu0 %v4311_v55  ;;  %1836 = vmatpush1.bf16.msra.mxu1 %v4366_v50 }
 0x1b0   : > { %1837 = vmatprep.subr.bf16.mxu1 %v4421_v1 }
 0x1b2   : > { %1797 = vmatpush1.bf16.msra.mxu0 %v4266_v45  ;;  %v4466_v3 = vpop.permute.xlu0 %391  ;;  %v2027_v45 = vld [vmem:[#allocation5 + $0x4] sm:$0xf] }
 0x1b3   : > { %1838 = vmatpush1.bf16.msra.mxu1 %v4374_v59  ;;  %1898 = vmatprep.subr.bf16.mxu0 %v3971_v10 }
 0x1b4   : > { %1939 = vmatprep.subr.bf16.mxu1 %v3993_v12 }
 0x1b5   : > { %3274 = vmatmul.mubr.msk.bf16.vlgmr.msra.gmra.mrb[32].mxu0 %vm926_vm4, %v1764_v24 }
 0x1b6   : > { %3275 = vmatmul.mubr.msk.bf16.vlgmr.msra.gmra.mrb[32].mxu1 %vm926_vm4, %v1764_v24  ;;  %1899 = vmatpush1.bf16.msra.mxu0 %v3960_v9  ;;  %v4475_v35 = vpop.permute.xlu0 %681 }
 0x1b7   : > { %1900 = vmatprep.subr.bf16.mxu0 %v4349_v20  ;;  %1940 = vmatpush1.bf16.msra.mxu1 %v3982_v11 }
 0x1b8   : > { %1941 = vmatprep.subr.bf16.mxu1 %v4439_v25  ;;  %1930 = vmatprep.mubr.bf16.mxu0 %v3640_v5 }
 0x1b9   : > { %1971 = vmatprep.mubr.bf16.mxu1 %v3640_v5 }
 0x1ba   : > { %1901 = vmatpush1.bf16.msra.mxu0 %v4282_v48  ;;  %v4481_v36 = vpop.permute.xlu0 %393 }
 0x1bb   : > { %1902 = vmatprep.subr.bf16.mxu0 %v4359_v7  ;;  %1942 = vmatpush1.bf16.msra.mxu1 %v4391_v63 }
 0x1bc   : > { %1943 = vmatprep.subr.bf16.mxu1 %v4450_v28 }
 0x1be   : > { %1903 = vmatpush1.bf16.msra.mxu0 %v4294_v51  ;;  %v4499_v38 = vpop.permute.xlu0 %683 }
 0x1bf   : > { %1904 = vmatprep.subr.bf16.mxu0 %v4366_v50  ;;  %1944 = vmatpush1.bf16.msra.mxu1 %v4402_v8 }
 0x1c0   : > { %1945 = vmatprep.subr.bf16.mxu1 %v4461_v30 }
 0x1c2   : > { %1905 = vmatpush1.bf16.msra.mxu0 %v4301_v53  ;;  %v4519_v43 = vpop.permute.xlu0 %395 }
 0x1c3   : > { %1906 = vmatprep.subr.bf16.mxu0 %v4374_v59  ;;  %1946 = vmatpush1.bf16.msra.mxu1 %v4412_v17 }
 0x1c4   : > { %1947 = vmatprep.subr.bf16.mxu1 %v4470_v34 }
 0x1c6   : > { %1907 = vmatpush1.bf16.msra.mxu0 %v4311_v55  ;;  %v4530_v46 = vpop.permute.xlu0 %685 }
 0x1c7   : > { %1948 = vmatpush1.bf16.msra.mxu1 %v4421_v1  ;;  %2036 = vmatprep.subr.bf16.mxu0 %v3982_v11 }
 0x1c8   : > { %2077 = vmatprep.subr.bf16.mxu1 %v4004_v13 }
 0x1c9   : > { %3276 = vmatmul.mubr.msk.bf16.vlgmr.msra.gmra.mrb[36].mxu0 %vm926_vm4, %v1874_v21 }
 0x1ca   : > { %3277 = vmatmul.mubr.msk.bf16.vlgmr.msra.gmra.mrb[36].mxu1 %vm926_vm4, %v1874_v21  ;;  %2037 = vmatpush1.bf16.msra.mxu0 %v3971_v10  ;;  %v4542_v47 = vpop.permute.xlu0 %397 }
 0x1cb   : > { %2038 = vmatprep.subr.bf16.mxu0 %v4391_v63  ;;  %2078 = vmatpush1.bf16.msra.mxu1 %v3993_v12 }
 0x1cc   : > { %2079 = vmatprep.subr.bf16.mxu1 %v4489_v33  ;;  %2068 = vmatprep.mubr.bf16.mxu0 %v3640_v5 }
 0x1cd   : > { %2109 = vmatprep.mubr.bf16.mxu1 %v3640_v5 }
 0x1ce   : > { %2039 = vmatpush1.bf16.msra.mxu0 %v4349_v20 }
 0x1cf   : > { %2040 = vmatprep.subr.bf16.mxu0 %v4402_v8  ;;  %2080 = vmatpush1.bf16.msra.mxu1 %v4439_v25 }
 0x1d0   : > { %2081 = vmatprep.subr.bf16.mxu1 %v4503_v39 }
 0x1d2   : > { %2041 = vmatpush1.bf16.msra.mxu0 %v4359_v7 }
 0x1d3   : > { %2042 = vmatprep.subr.bf16.mxu0 %v4412_v17  ;;  %2082 = vmatpush1.bf16.msra.mxu1 %v4450_v28 }
 0x1d4   : > { %2083 = vmatprep.subr.bf16.mxu1 %v4512_v40 }
 0x1d6   : > { %2043 = vmatpush1.bf16.msra.mxu0 %v4366_v50 }
 0x1d7   : > { %2044 = vmatprep.subr.bf16.mxu0 %v4421_v1  ;;  %2084 = vmatpush1.bf16.msra.mxu1 %v4461_v30 }
 0x1d8   : > { %2085 = vmatprep.subr.bf16.mxu1 %v4524_v44 }
 0x1da   : > { %2045 = vmatpush1.bf16.msra.mxu0 %v4374_v59 }
 0x1db   : > { %2086 = vmatpush1.bf16.msra.mxu1 %v4470_v34  ;;  %2121 = vmatprep.subr.bf16.mxu0 %v3971_v10 }
 0x1dc   : > { %2162 = vmatprep.subr.bf16.mxu1 %v3993_v12 }
 0x1dd   : > { %3280 = vmatmul.mubr.msk.bf16.vlgmr.msra.gmra.mrb[40].mxu0 %vm926_vm4, %v2027_v45 }
 0x1de   : > { %3281 = vmatmul.mubr.msk.bf16.vlgmr.msra.gmra.mrb[40].mxu1 %vm926_vm4, %v2027_v45  ;;  %2122 = vmatpush1.bf16.msra.mxu0 %v3960_v9  ;;  %v4550_v9 = vpop.permute.xlu0 %687 }
 0x1df   : > { %2123 = vmatprep.subr.bf16.mxu0 %v4349_v20  ;;  %2163 = vmatpush1.bf16.msra.mxu1 %v3982_v11 }
 0x1e0   : > { %2164 = vmatprep.subr.bf16.mxu1 %v4439_v25  ;;  %2153 = vmatprep.mubr.bf16.mxu0 %v3640_v5 }
 0x1e1   : > { %2194 = vmatprep.mubr.bf16.mxu1 %v3640_v5 }
 0x1e2   : > { %2124 = vmatpush1.bf16.msra.mxu0 %v4282_v48  ;;  %v400_v2 = vpop.permute.xlu0 %399 }
 0x1e3   : > { %2125 = vmatprep.subr.bf16.mxu0 %v4359_v7  ;;  %2165 = vmatpush1.bf16.msra.mxu1 %v4391_v63  ;;  %v4561_v20 = vsel %vm401_vm0, %v4542_v47, %v400_v2 }
 0x1e4   : > { %2166 = vmatprep.subr.bf16.mxu1 %v4450_v28 }
 0x1e6   : > { %2126 = vmatpush1.bf16.msra.mxu0 %v4294_v51 }
 0x1e7   : > { %2127 = vmatprep.subr.bf16.mxu0 %v4366_v50  ;;  %2167 = vmatpush1.bf16.msra.mxu1 %v4402_v8 }
 0x1e8   : > { %v964_v10 = vpop.f32.mrb[0].mxu0  ;;  %2168 = vmatprep.subr.bf16.mxu1 %v4461_v30 }
 0x1e9   : > { %v966_v49 = vpop.f32.mrb[1].mxu0  ;;  %v1005_v52 = vpop.f32.mrb[0].mxu1 }
 0x1ea   : > { %v968_v48 = vpop.f32.mrb[2].mxu0  ;;  %v1007_v54 = vpop.f32.mrb[1].mxu1  ;;  %2128 = vmatpush1.bf16.msra.mxu0 %v4301_v53  ;;  %v4573_v53 = vsel %vm401_vm0, %v4407_v16, %v4426_v18  ;;  %v4608_v16 = vld [vmem:[%s3833_s25 + $0x60] sm:$0xff]  ;;  %v4639_v18 = vsel %vm691_vm2, %v4432_v22, %v4455_v29 }
 0x1eb   : > { %v969_v56 = vpop.f32.mrb[3].mxu0  ;;  %v1009_v0 = vpop.f32.mrb[2].mxu1  ;;  %2129 = vmatprep.subr.bf16.mxu0 %v4374_v59  ;;  %2169 = vmatpush1.bf16.msra.mxu1 %v4412_v17 }
 0x1ec   : > { %v1010_v51 = vpop.f32.mrb[3].mxu1  ;;  %2170 = vmatprep.subr.bf16.mxu1 %v4470_v34  ;;  %v4664_v56 = vsel %vm401_vm0, %v4445_v27, %v4466_v3  ;;  %v4685_v27 = vsel %vm691_vm2, %v4455_v29, %v4475_v35 }
 0x1ee   : > { %2130 = vmatpush1.bf16.msra.mxu0 %v4311_v55  ;;  %v533_v55 = vpop.permute.xlu1 %532 }
 0x1ef   : > { %2171 = vmatpush1.bf16.msra.mxu1 %v4421_v1  ;;  %2227 = vmatprep.subr.bf16.mxu0 %v3993_v12  ;;  %v4592_v12 = vsel %vm691_vm2, %v4417_v23, %v4432_v22  ;;  %v4622_v23 = vld [vmem:[%s3833_s25 + $0x68] sm:$0xff] }
 0x1f0   : > { %2268 = vmatprep.subr.bf16.mxu1 %v4015_v14 }
 0x1f1   : > { %3282 = vmatmul.mubr.msk.bf16.vlgmr.msra.gmra.mrb[44].mxu0 %vm926_vm4, %v2006_v31 }
 0x1f2   : > { %3283 = vmatmul.mubr.msk.bf16.vlgmr.msra.gmra.mrb[44].mxu1 %vm926_vm4, %v2006_v31  ;;  %2228 = vmatpush1.bf16.msra.mxu0 %v3982_v11  ;;  %v4583_v11 = vsel %vm546_vm1, %v4493_v37, %v533_v55 }
 0x1f3   : > { %2229 = vmatprep.subr.bf16.mxu0 %v4439_v25  ;;  %2269 = vmatpush1.bf16.msra.mxu1 %v4004_v13  ;;  %v823_v13 = vpop.permute.xlu1 %822 }
 0x1f4   : > { %2270 = vmatprep.subr.bf16.mxu1 %v4573_v53  ;;  %2259 = vmatprep.mubr.bf16.mxu0 %v3640_v5  ;;  %v4600_v61 = vsel %vm836_vm3, %v4516_v42, %v823_v13 }
 0x1f5   : > { %2300 = vmatprep.mubr.bf16.mxu1 %v3640_v5 }
 0x1f6   : > { %2230 = vmatpush1.bf16.msra.mxu0 %v4391_v63 }
 0x1f7   : > { %2231 = vmatprep.subr.bf16.mxu0 %v4450_v28  ;;  %2271 = vmatpush1.bf16.msra.mxu1 %v4489_v33 }
 0x1f8   : > { %2272 = vmatprep.subr.bf16.mxu1 %v4583_v11 }
 0x1fa   : > { %2232 = vmatpush1.bf16.msra.mxu0 %v4402_v8  ;;  %v2203_v8 = vld [vmem:[#allocation5 + $0x8] sm:$0xf] }
 0x1fb   : > { %2233 = vmatprep.subr.bf16.mxu0 %v4461_v30  ;;  %2273 = vmatpush1.bf16.msra.mxu1 %v4503_v39 }
 0x1fc   : > { %v1049_v14 = vpop.f32.mrb[4].mxu0  ;;  %2274 = vmatprep.subr.bf16.mxu1 %v4592_v12 }
 0x1fd   : > { %v1050_v7 = vadd.f32 %v1049_v14, %v964_v10  ;;  %v1051_v41 = vpop.f32.mrb[5].mxu0  ;;  %v1090_v50 = vpop.f32.mrb[4].mxu1 }
 0x1fe   : > { %v1052_v57 = vadd.f32 %v1051_v41, %v966_v49  ;;  %v1091_v58 = vadd.f32 %v1090_v50, %v1005_v52  ;;  %v1053_v59 = vpop.f32.mrb[6].mxu0  ;;  %v1092_v60 = vpop.f32.mrb[5].mxu1  ;;  %2234 = vmatpush1.bf16.msra.mxu0 %v4412_v17  ;;  %v3466_v17 = vld [vmem:[%s3833_s25 + $0x58] sm:$0xff] }
 0x1ff   : > { %v1093_v62 = vadd.f32 %v1092_v60, %v1007_v54  ;;  %v1054_v63 = vpop.f32.mrb[7].mxu0  ;;  %v1094_v4 = vpop.f32.mrb[6].mxu1  ;;  %2235 = vmatprep.subr.bf16.mxu0 %v4470_v34  ;;  %2275 = vmatpush1.bf16.msra.mxu1 %v4512_v40  ;;  %v2313_v54 = vld [vmem:[#allocation5 + $0xc] sm:$0xf] }
 0x200   : > { %v1095_v6 = vpop.f32.mrb[7].mxu1  ;;  %2276 = vmatprep.subr.bf16.mxu1 %v4600_v61  ;;  %v2423_v63 = vld [vmem:[#allocation5 + $0x10] sm:$0xf] }
 0x201   : > { %v4701_v4 = vld [vmem:[%s3833_s25 + $0x80] sm:$0xff]  ;;  %v4710_v6 = vsel %vm401_vm0, %v4466_v3, %v4481_v36 }
 0x202   : > { %2236 = vmatpush1.bf16.msra.mxu0 %v4421_v1  ;;  %v535_v1 = vpop.permute.xlu1 %534 }
 0x203   : > { %2277 = vmatpush1.bf16.msra.mxu1 %v4524_v44  ;;  %2337 = vmatprep.subr.bf16.mxu0 %v4608_v16 }
 0x204   : > { %2378 = vmatprep.subr.bf16.mxu1 %v4026_v15  ;;  %v4630_v15 = vsel %vm546_vm1, %v533_v55, %v535_v1 }
 0x205   : > { %3284 = vmatmul.mubr.msk.bf16.vlgmr.msra.gmra.mrb[48].mxu0 %vm926_vm4, %v2203_v8 }
 0x206   : > { %3285 = vmatmul.mubr.msk.bf16.vlgmr.msra.gmra.mrb[48].mxu1 %vm926_vm4, %v2203_v8  ;;  %2338 = vmatpush1.bf16.msra.mxu0 %v3466_v17  ;;  %v825_v24 = vpop.permute.xlu1 %824  ;;  %v4720_v17 = vpop.permute.xlu0 %689 }
 0x207   : > { %2339 = vmatprep.subr.bf16.mxu0 %v4489_v33  ;;  %2379 = vmatpush1.bf16.msra.mxu1 %v4622_v23  ;;  %v4646_v22 = vsel %vm836_vm3, %v823_v13, %v825_v24 }
 0x208   : > { %2380 = vmatprep.subr.bf16.mxu1 %v4618_v19  ;;  %2369 = vmatprep.mubr.bf16.mxu0 %v3640_v5 }
 0x209   : > { %2410 = vmatprep.mubr.bf16.mxu1 %v3640_v5 }
 0x20a   : > { %2340 = vmatpush1.bf16.msra.mxu0 %v4439_v25  ;;  %v537_v0 = vpop.permute.xlu1 %536 }
 0x20b   : > { %2341 = vmatprep.subr.bf16.mxu0 %v4503_v39  ;;  %2381 = vmatpush1.bf16.msra.mxu1 %v4573_v53  ;;  %v4676_v51 = vsel %vm546_vm1, %v535_v1, %v537_v0  ;;  %v4733_v1 = vsel %vm691_vm2, %v4475_v35, %v4499_v38 }
 0x20c   : > { %2382 = vmatprep.subr.bf16.mxu1 %v4630_v15 }
 0x20e   : > { %2342 = vmatpush1.bf16.msra.mxu0 %v4450_v28  ;;  %v827_v2 = vpop.permute.xlu1 %826 }
 0x20f   : > { %2343 = vmatprep.subr.bf16.mxu0 %v4512_v40  ;;  %2383 = vmatpush1.bf16.msra.mxu1 %v4583_v11  ;;  %v4692_v29 = vsel %vm836_vm3, %v825_v24, %v827_v2 }
 0x210   : > { %v1156_v25 = vpop.f32.mrb[8].mxu0  ;;  %2384 = vmatprep.subr.bf16.mxu1 %v4639_v18 }
 0x211   : > { %v1204_v26 = vadd.f32 %v1156_v25, %v1050_v7  ;;  %v1158_v32 = vpop.f32.mrb[9].mxu0  ;;  %v1197_v21 = vpop.f32.mrb[8].mxu1 }
 0x212   : > { %v1205_v37 = vadd.f32 %v1158_v32, %v1052_v57  ;;  %v1206_v42 = vadd.f32 %v1197_v21, %v1091_v58  ;;  %v1160_v28 = vpop.f32.mrb[10].mxu0  ;;  %v1199_v45 = vpop.f32.mrb[9].mxu1  ;;  %2344 = vmatpush1.bf16.msra.mxu0 %v4461_v30  ;;  %v4655_v30 = vld [vmem:[%s3833_s25 + $0x78] sm:$0xff] }
 0x213   : > { %v1207_v10 = vadd.f32 %v1199_v45, %v1093_v62  ;;  %v1161_v49 = vpop.f32.mrb[11].mxu0  ;;  %v1201_v52 = vpop.f32.mrb[10].mxu1  ;;  %2345 = vmatprep.subr.bf16.mxu0 %v4524_v44  ;;  %2385 = vmatpush1.bf16.msra.mxu1 %v4592_v12 }
 0x214   : > { %v1202_v48 = vpop.f32.mrb[11].mxu1  ;;  %2386 = vmatprep.subr.bf16.mxu1 %v4646_v22  ;;  %v4714_v8 = vpop.permute.xlu1 %538 }
 0x215   : > { %v4724_v3 = vsel %vm546_vm1, %v537_v0, %v4714_v8 }
 0x216   : > { %2346 = vmatpush1.bf16.msra.mxu0 %v4470_v34  ;;  %v4668_v34 = vld [vmem:[%s3833_s25 + $0x70] sm:$0xff] }
 0x217   : > { %2387 = vmatpush1.bf16.msra.mxu1 %v4600_v61  ;;  %2447 = vmatprep.subr.bf16.mxu0 %v4622_v23 }
 0x218   : > { %2488 = vmatprep.subr.bf16.mxu1 %v4655_v30  ;;  %v4735_v24 = vpop.permute.xlu1 %828 }
 0x219   : > { %3286 = vmatmul.mubr.msk.bf16.vlgmr.msra.gmra.mrb[52].mxu0 %vm926_vm4, %v2313_v54  ;;  %v4745_v35 = vsel %vm836_vm3, %v827_v2, %v4735_v24 }
 0x21a   : > { %3287 = vmatmul.mubr.msk.bf16.vlgmr.msra.gmra.mrb[52].mxu1 %vm926_vm4, %v2313_v54  ;;  %2448 = vmatpush1.bf16.msra.mxu0 %v4608_v16 }
 0x21b   : > { %2449 = vmatprep.subr.bf16.mxu0 %v4573_v53  ;;  %2489 = vmatpush1.bf16.msra.mxu1 %v4668_v34 }
 0x21c   : > { %2490 = vmatprep.subr.bf16.mxu1 %v4664_v56  ;;  %2479 = vmatprep.mubr.bf16.mxu0 %v3640_v5 }
 0x21d   : > { %2520 = vmatprep.mubr.bf16.mxu1 %v3640_v5 }
 0x21e   : > { %2450 = vmatpush1.bf16.msra.mxu0 %v4489_v33 }
 0x21f   : > { %2451 = vmatprep.subr.bf16.mxu0 %v4583_v11  ;;  %2491 = vmatpush1.bf16.msra.mxu1 %v4618_v19 }
 0x220   : > { %2492 = vmatprep.subr.bf16.mxu1 %v4676_v51 }
 0x222   : > { %2452 = vmatpush1.bf16.msra.mxu0 %v4503_v39 }
 0x223   : > { %2453 = vmatprep.subr.bf16.mxu0 %v4592_v12  ;;  %2493 = vmatpush1.bf16.msra.mxu1 %v4630_v15 }
 0x224   : > { %v1267_v31 = vpop.f32.mrb[12].mxu0  ;;  %2494 = vmatprep.subr.bf16.mxu1 %v4685_v27 }
 0x225   : > { %v1315_v55 = vadd.f32 %v1267_v31, %v1204_v26  ;;  %v1269_v13 = vpop.f32.mrb[13].mxu0  ;;  %v1308_v14 = vpop.f32.mrb[12].mxu1 }
 0x226   : > { %v1316_v7 = vadd.f32 %v1269_v13, %v1205_v37  ;;  %v1317_v41 = vadd.f32 %v1308_v14, %v1206_v42  ;;  %v1271_v50 = vpop.f32.mrb[14].mxu0  ;;  %v1310_v57 = vpop.f32.mrb[13].mxu1  ;;  %2454 = vmatpush1.bf16.msra.mxu0 %v4512_v40  ;;  %v2576_v13 = vld [vmem:[#allocation5 + $0x4] sm:$0xf] }
 0x227   : > { %v1318_v58 = vadd.f32 %v1310_v57, %v1207_v10  ;;  %v1272_v59 = vpop.f32.mrb[15].mxu0  ;;  %v1312_v60 = vpop.f32.mrb[14].mxu1  ;;  %2455 = vmatprep.subr.bf16.mxu0 %v4600_v61  ;;  %2495 = vmatpush1.bf16.msra.mxu1 %v4639_v18  ;;  %v4784_v57 = vld [vmem:[%s3833_s25 + $0x88] sm:$0xff] }
 0x228   : > { %v1313_v62 = vpop.f32.mrb[15].mxu1  ;;  %2496 = vmatprep.subr.bf16.mxu1 %v4692_v29  ;;  %v4740_v26 = vpop.permute.xlu0 %1432 }
 0x22a   : > { %2456 = vmatpush1.bf16.msra.mxu0 %v4524_v44 }
 0x22b   : > { %2497 = vmatpush1.bf16.msra.mxu1 %v4646_v22  ;;  %2585 = vmatprep.subr.bf16.mxu0 %v4668_v34 }
 0x22c   : > { %2626 = vmatprep.subr.bf16.mxu1 %v4701_v4 }
 0x22d   : > { %3288 = vmatmul.mubr.msk.bf16.vlgmr.msra.gmra.mrb[56].mxu0 %vm926_vm4, %v2423_v63 }
 0x22e   : > { %3289 = vmatmul.mubr.msk.bf16.vlgmr.msra.gmra.mrb[56].mxu1 %vm926_vm4, %v2423_v63  ;;  %2586 = vmatpush1.bf16.msra.mxu0 %v4622_v23 }
 0x22f   : > { %2587 = vmatprep.subr.bf16.mxu0 %v4618_v19  ;;  %2627 = vmatpush1.bf16.msra.mxu1 %v4655_v30 }
 0x230   : > { %2628 = vmatprep.subr.bf16.mxu1 %v4710_v6  ;;  %2617 = vmatprep.mubr.bf16.mxu0 %v3640_v5 }
 0x231   : > { %2658 = vmatprep.mubr.bf16.mxu1 %v3640_v5 }
 0x232   : > { %2588 = vmatpush1.bf16.msra.mxu0 %v4573_v53 }
 0x233   : > { %2589 = vmatprep.subr.bf16.mxu0 %v4630_v15  ;;  %2629 = vmatpush1.bf16.msra.mxu1 %v4664_v56 }
 0x234   : > { %2630 = vmatprep.subr.bf16.mxu1 %v4724_v3 }
 0x236   : > { %2590 = vmatpush1.bf16.msra.mxu0 %v4583_v11 }
 0x237   : > { %2591 = vmatprep.subr.bf16.mxu0 %v4639_v18  ;;  %2631 = vmatpush1.bf16.msra.mxu1 %v4676_v51 }
 0x238   : > { %v1378_v25 = vpop.f32.mrb[16].mxu0  ;;  %2632 = vmatprep.subr.bf16.mxu1 %v4733_v1 }
 0x239   : > { %v1426_v32 = vadd.f32 %v1378_v25, %v1315_v55  ;;  %v1380_v21 = vpop.f32.mrb[17].mxu0  ;;  %v1419_v37 = vpop.f32.mrb[16].mxu1 }
 0x23a   : > { %v1427_v42 = vadd.f32 %v1380_v21, %v1316_v7  ;;  %v1428_v28 = vadd.f32 %v1419_v37, %v1317_v41  ;;  %v1382_v45 = vpop.f32.mrb[18].mxu0  ;;  %v1421_v10 = vpop.f32.mrb[17].mxu1  ;;  %2592 = vmatpush1.bf16.msra.mxu0 %v4592_v12 }
 0x23b   : > { %v1429_v49 = vadd.f32 %v1421_v10, %v1318_v58  ;;  %v1383_v52 = vpop.f32.mrb[19].mxu0  ;;  %v1423_v48 = vpop.f32.mrb[18].mxu1  ;;  %2593 = vmatprep.subr.bf16.mxu0 %v4646_v22  ;;  %2633 = vmatpush1.bf16.msra.mxu1 %v4685_v27  ;;  %v1435_v54 = vadd.f32 %v4740_v26, %v1426_v32 }
 0x23c   : > { %v1437_v0 = vadd.f32 %v4740_v26, %v1428_v28  ;;  %v1424_v31 = vpop.f32.mrb[19].mxu1  ;;  %2634 = vmatprep.subr.bf16.mxu1 %v4745_v35  ;;  %v1436_v55 = vadd.f32 %v4740_v26, %v1427_v42  ;;  %v2752_v42 = vld [vmem:[#allocation5 + $0x8] sm:$0xf] }
 0x23d   : > { %v1438_v2 = vadd.f32 %v4740_v26, %v1429_v49 }
 0x23e   : > { %2594 = vmatpush1.bf16.msra.mxu0 %v4600_v61  ;;  %v3317_v14 = vpack.c.bf16 %v1436_v55, %v1435_v54 }
 0x23f   : > { %v3318_v7 = vpack.c.bf16 %v1438_v2, %v1437_v0  ;;  %2635 = vmatpush1.bf16.msra.mxu1 %v4692_v29  ;;  %2670 = vmatprep.subr.bf16.mxu0 %v4622_v23  ;;  %v2862_v2 = vld [vmem:[#allocation5 + $0xc] sm:$0xf] }
 0x240   : > { %2711 = vmatprep.subr.bf16.mxu1 %v4655_v30  ;;  %1455 = vst [vmem:[%s3802_s5] sm:$0xff] %v3317_v14 }
 0x241   : > { %1456 = vst [vmem:[%s3802_s5 + $0x8] sm:$0xff] %v3318_v7  ;;  %3292 = vmatmul.mubr.msk.bf16.vlgmr.msra.gmra.mrb[60].mxu0 %vm926_vm4, %v2576_v13 }
 0x242   : > { %3293 = vmatmul.mubr.msk.bf16.vlgmr.msra.gmra.mrb[60].mxu1 %vm926_vm4, %v2576_v13  ;;  %2671 = vmatpush1.bf16.msra.mxu0 %v4608_v16  ;;  %v3473_v13 = vld [vmem:[%s3833_s25 + $0x98] sm:$0xff] }
 0x243   : > { %2672 = vmatprep.subr.bf16.mxu0 %v4573_v53  ;;  %2712 = vmatpush1.bf16.msra.mxu1 %v4668_v34 }
 0x244   : > { %2713 = vmatprep.subr.bf16.mxu1 %v4664_v56  ;;  %2702 = vmatprep.mubr.bf16.mxu0 %v3640_v5 }
 0x245   : > { %2743 = vmatprep.mubr.bf16.mxu1 %v3640_v5 }
 0x246   : > { %2673 = vmatpush1.bf16.msra.mxu0 %v4489_v33 }
 0x247   : > { %2674 = vmatprep.subr.bf16.mxu0 %v4583_v11  ;;  %2714 = vmatpush1.bf16.msra.mxu1 %v4618_v19 }
 0x248   : > { %2715 = vmatprep.subr.bf16.mxu1 %v4676_v51 }
 0x24a   : > { %2675 = vmatpush1.bf16.msra.mxu0 %v4503_v39 }
 0x24b   : > { %2676 = vmatprep.subr.bf16.mxu0 %v4592_v12  ;;  %2716 = vmatpush1.bf16.msra.mxu1 %v4630_v15  ;;  %v2555_v12 = vld [vmem:[#allocation5] sm:$0xf] }
 0x24c   : > { %v1521_v53 = vpop.f32.mrb[20].mxu0  ;;  %2717 = vmatprep.subr.bf16.mxu1 %v4685_v27 }
 0x24d   : > { %v1523_v16 = vpop.f32.mrb[21].mxu0  ;;  %v1562_v23 = vpop.f32.mrb[20].mxu1 }
 0x24e   : > { %v1525_v41 = vpop.f32.mrb[22].mxu0  ;;  %v1564_v33 = vpop.f32.mrb[21].mxu1  ;;  %2677 = vmatpush1.bf16.msra.mxu0 %v4512_v40  ;;  %v4795_v40 = vsel %vm401_vm0, %v4481_v36, %v4519_v43  ;;  %v4814_v36 = vsel %vm691_vm2, %v4499_v38, %v4530_v46 }
 0x24f   : > { %v1526_v11 = vpop.f32.mrb[23].mxu0  ;;  %v1566_v50 = vpop.f32.mrb[22].mxu1  ;;  %2678 = vmatprep.subr.bf16.mxu0 %v4600_v61  ;;  %2718 = vmatpush1.bf16.msra.mxu1 %v4639_v18 }
 0x250   : > { %v1567_v39 = vpop.f32.mrb[23].mxu1  ;;  %2719 = vmatprep.subr.bf16.mxu1 %v4692_v29  ;;  %v2972_v50 = vld [vmem:[#allocation5 + $0x10] sm:$0xf] }
 0x252   : > { %2679 = vmatpush1.bf16.msra.mxu0 %v4524_v44  ;;  %v541_v44 = vpop.permute.xlu1 %540 }
 0x253   : > { %2720 = vmatpush1.bf16.msra.mxu1 %v4646_v22  ;;  %2776 = vmatprep.subr.bf16.mxu0 %v4655_v30  ;;  %v4805_v61 = vsel %vm546_vm1, %v4714_v8, %v541_v44 }
 0x254   : > { %2817 = vmatprep.subr.bf16.mxu1 %v4784_v57 }
 0x255   : > { %3294 = vmatmul.mubr.msk.bf16.vlgmr.msra.gmra.mrb[64].mxu0 %vm926_vm4, %v2555_v12 }
 0x256   : > { %3295 = vmatmul.mubr.msk.bf16.vlgmr.msra.gmra.mrb[64].mxu1 %vm926_vm4, %v2555_v12  ;;  %2777 = vmatpush1.bf16.msra.mxu0 %v4668_v34 }
 0x257   : > { %2778 = vmatprep.subr.bf16.mxu0 %v4664_v56  ;;  %2818 = vmatpush1.bf16.msra.mxu1 %v4701_v4 }
 0x258   : > { %2819 = vmatprep.subr.bf16.mxu1 %v4795_v40  ;;  %2808 = vmatprep.mubr.bf16.mxu0 %v3640_v5 }
 0x259   : > { %2849 = vmatprep.mubr.bf16.mxu1 %v3640_v5 }
 0x25a   : > { %2779 = vmatpush1.bf16.msra.mxu0 %v4618_v19  ;;  %v831_v19 = vpop.permute.xlu1 %830 }
 0x25b   : > { %2780 = vmatprep.subr.bf16.mxu0 %v4676_v51  ;;  %2820 = vmatpush1.bf16.msra.mxu1 %v4710_v6  ;;  %v4822_v38 = vsel %vm836_vm3, %v4735_v24, %v831_v19 }
 0x25c   : > { %2821 = vmatprep.subr.bf16.mxu1 %v4805_v61 }
 0x25e   : > { %2781 = vmatpush1.bf16.msra.mxu0 %v4630_v15  ;;  %v543_v24 = vpop.permute.xlu1 %542 }
 0x25f   : > { %2782 = vmatprep.subr.bf16.mxu0 %v4685_v27  ;;  %2822 = vmatpush1.bf16.msra.mxu1 %v4724_v3 }
 0x260   : > { %v1606_v34 = vpop.f32.mrb[24].mxu0  ;;  %2823 = vmatprep.subr.bf16.mxu1 %v4814_v36 }
 0x261   : > { %v1607_v58 = vadd.f32 %v1606_v34, %v1521_v53  ;;  %v1608_v59 = vpop.f32.mrb[25].mxu0  ;;  %v1647_v60 = vpop.f32.mrb[24].mxu1 }
 0x262   : > { %v1609_v62 = vadd.f32 %v1608_v59, %v1523_v16  ;;  %v1648_v63 = vadd.f32 %v1647_v60, %v1562_v23  ;;  %v1610_v15 = vpop.f32.mrb[26].mxu0  ;;  %v1649_v8 = vpop.f32.mrb[25].mxu1  ;;  %2783 = vmatpush1.bf16.msra.mxu0 %v4639_v18  ;;  %v3472_v18 = vld [vmem:[%s3833_s25 + $0x90] sm:$0xff]  ;;  %s3306_s25 = sshll.u32 %s3830_s8, 4  ;;  %s3123_s8 = sshll.u32 %s3802_s5, 4  ;;  %s4902_s8 = int_to_ptr.vmem [resolvable:$true] %s3123_s8 }
 0x263   : > { %v1650_v25 = vadd.f32 %v1649_v8, %v1564_v33  ;;  %v1611_v32 = vpop.f32.mrb[27].mxu0  ;;  %v1651_v21 = vpop.f32.mrb[26].mxu1  ;;  %2784 = vmatprep.subr.bf16.mxu0 %v4692_v29  ;;  %2824 = vmatpush1.bf16.msra.mxu1 %v4733_v1  ;;  %s3119_s28 = sadd.s32 %s3307_s26, %s3306_s25  ;;  %s3502_s9 = scalar_lea.vmem %s4902_s8, 1024 }
 0x264   : > { %v1652_v37 = vpop.f32.mrb[27].mxu1  ;;  %2825 = vmatprep.subr.bf16.mxu1 %v4822_v38  ;;  %s3308_s17 = sshll.u32 %s3119_s28, 6  ;;  %p3503_p1 = scmp.ne.s32.totalorder %s4902_s8, %s3502_s9 }
 0x265   : > { %s4900_s20 = scalar_lea.hbm %s4966_s3, %s3308_s17  ;;  %p3509_p9 = scmp.lt.s32.totalorder %s4902_s8, %s3507_s15 }
 0x266   : > { %2785 = vmatpush1.bf16.msra.mxu0 %v4646_v22  ;;  %v420_v22 = vsel %vm401_vm0, %v4519_v43, %v4542_v47  ;;  %v710_v43 = vsel %vm691_vm2, %v4530_v46, %v4550_v9  ;;  %v833_v47 = vpop.permute.xlu1 %832  ;;  %p3504_p5 = pnand %p3503_p1, %p4998_p3  ;;  %p3510_p10 = scmp.lt.s32.totalorder %s3508_s30, %s3502_s9 }
 0x267   : > { %2826 = vmatpush1.bf16.msra.mxu1 %v4745_v35  ;;  %2886 = vmatprep.subr.bf16.mxu0 %v4701_v4  ;;  %v855_v46 = vsel %vm836_vm3, %v831_v19, %v833_v47 }
 0x268   : > { %2927 = vmatprep.subr.bf16.mxu1 %v3472_v18  ;;  %p3505_p7 = pneg %p3504_p5  ;;  %p3511_p12 = por %p3510_p10, %p3509_p9 }
 0x269   : > { %3296 = vmatmul.mubr.msk.bf16.vlgmr.msra.gmra.mrb[68].mxu0 %vm926_vm4, %v2752_v42 }
 0x26a   : > { %3297 = vmatmul.mubr.msk.bf16.vlgmr.msra.gmra.mrb[68].mxu1 %vm926_vm4, %v2752_v42  ;;  %2887 = vmatpush1.bf16.msra.mxu0 %v4655_v30  ;;  %v565_v30 = vsel %vm546_vm1, %v541_v44, %v543_v24  ;;  %p3512_p0 = pnand %p3511_p12, %p3505_p7 }
 0x26b   : > { %2888 = vmatprep.subr.bf16.mxu0 %v4710_v6  ;;  %2928 = vmatpush1.bf16.msra.mxu1 %v4784_v57 }
 0x26c   : > { %2929 = vmatprep.subr.bf16.mxu1 %v420_v22  ;;  %2918 = vmatprep.mubr.bf16.mxu0 %v3640_v5 }
 0x26d   : > { %2959 = vmatprep.mubr.bf16.mxu1 %v3640_v5 }
 0x26e   : > { %2889 = vmatpush1.bf16.msra.mxu0 %v4664_v56 }
 0x26f   : > { %2890 = vmatprep.subr.bf16.mxu0 %v4724_v3  ;;  %2930 = vmatpush1.bf16.msra.mxu1 %v4795_v40 }
 0x270   : > { %2931 = vmatprep.subr.bf16.mxu1 %v565_v30 }
 0x272   : > { %2891 = vmatpush1.bf16.msra.mxu0 %v4676_v51 }
 0x273   : > { %2892 = vmatprep.subr.bf16.mxu0 %v4733_v1  ;;  %2932 = vmatpush1.bf16.msra.mxu1 %v4805_v61 }
 0x274   : > { %v1712_v28 = vpop.f32.mrb[28].mxu0  ;;  %2933 = vmatprep.subr.bf16.mxu1 %v710_v43 }
 0x275   : > { %v1760_v56 = vadd.f32 %v1712_v28, %v1607_v58  ;;  %v1714_v45 = vpop.f32.mrb[29].mxu0  ;;  %v1753_v10 = vpop.f32.mrb[28].mxu1 }
 0x276   : > { %v1761_v49 = vadd.f32 %v1714_v45, %v1609_v62  ;;  %v1762_v52 = vadd.f32 %v1753_v10, %v1648_v63  ;;  %v1716_v48 = vpop.f32.mrb[30].mxu0  ;;  %v1755_v54 = vpop.f32.mrb[29].mxu1  ;;  %2893 = vmatpush1.bf16.msra.mxu0 %v4685_v27 }
 0x277   : > { %v1763_v51 = vadd.f32 %v1755_v54, %v1650_v25  ;;  %v1717_v0 = vpop.f32.mrb[31].mxu0  ;;  %v1757_v31 = vpop.f32.mrb[30].mxu1  ;;  %2894 = vmatprep.subr.bf16.mxu0 %v4745_v35  ;;  %2934 = vmatpush1.bf16.msra.mxu1 %v4814_v36 }
 0x278   : > { %v1758_v55 = vpop.f32.mrb[31].mxu1  ;;  %2935 = vmatprep.subr.bf16.mxu1 %v855_v46  ;;  %v545_v27 = vpop.permute.xlu1 %544 }
 0x27a   : > { %2895 = vmatpush1.bf16.msra.mxu0 %v4692_v29  ;;  %v566_v29 = vsel %vm546_vm1, %v543_v24, %v545_v27 }
 0x27b   : > { %2936 = vmatpush1.bf16.msra.mxu1 %v4822_v38  ;;  %2996 = vmatprep.subr.bf16.mxu0 %v4784_v57 }
 0x27c   : > { %3037 = vmatprep.subr.bf16.mxu1 %v3473_v13 }
 0x27d   : > { %3298 = vmatmul.mubr.msk.bf16.vlgmr.msra.gmra.mrb[72].mxu0 %vm926_vm4, %v2862_v2 }
 0x27e   : > { %3299 = vmatmul.mubr.msk.bf16.vlgmr.msra.gmra.mrb[72].mxu1 %vm926_vm4, %v2862_v2  ;;  %2997 = vmatpush1.bf16.msra.mxu0 %v4701_v4  ;;  %v835_v4 = vpop.permute.xlu1 %834 }
 0x27f   : > { %2998 = vmatprep.subr.bf16.mxu0 %v4795_v40  ;;  %3038 = vmatpush1.bf16.msra.mxu1 %v3472_v18 }
 0x280   : > { %3039 = vmatprep.subr.bf16.mxu1 %v4561_v20  ;;  %3028 = vmatprep.mubr.bf16.mxu0 %v3640_v5  ;;  %v711_v20 = vsel %vm691_vm2, %v4550_v9, %v4720_v17  ;;  %v856_v9 = vsel %vm836_vm3, %v833_v47, %v835_v4 }
 0x281   : > { %3069 = vmatprep.mubr.bf16.mxu1 %v3640_v5 }
 0x282   : > { %2999 = vmatpush1.bf16.msra.mxu0 %v4710_v6 }
 0x283   : > { %3000 = vmatprep.subr.bf16.mxu0 %v4805_v61  ;;  %3040 = vmatpush1.bf16.msra.mxu1 %v420_v22 }
 0x284   : > { %3041 = vmatprep.subr.bf16.mxu1 %v566_v29 }
 0x286   : > { %3001 = vmatpush1.bf16.msra.mxu0 %v4724_v3 }
 0x287   : > { %3002 = vmatprep.subr.bf16.mxu0 %v4814_v36  ;;  %3042 = vmatpush1.bf16.msra.mxu1 %v565_v30 }
 0x288   : > { %v1822_v14 = vpop.f32.mrb[32].mxu0  ;;  %3043 = vmatprep.subr.bf16.mxu1 %v711_v20 }
 0x289   : > { %v1870_v5 = vadd.f32 %v1822_v14, %v1760_v56  ;;  %v1824_v6 = vpop.f32.mrb[33].mxu0  ;;  %v1863_v7 = vpop.f32.mrb[32].mxu1 }
 0x28a   : > { %v1871_v53 = vadd.f32 %v1824_v6, %v1761_v49  ;;  %v1872_v16 = vadd.f32 %v1863_v7, %v1762_v52  ;;  %v1826_v23 = vpop.f32.mrb[34].mxu0  ;;  %v1865_v41 = vpop.f32.mrb[33].mxu1  ;;  %3003 = vmatpush1.bf16.msra.mxu0 %v4733_v1 }
 0x28b   : > { %v1873_v3 = vadd.f32 %v1865_v41, %v1763_v51  ;;  %v1827_v33 = vpop.f32.mrb[35].mxu0  ;;  %v1867_v11 = vpop.f32.mrb[34].mxu1  ;;  %3004 = vmatprep.subr.bf16.mxu0 %v4822_v38  ;;  %3044 = vmatpush1.bf16.msra.mxu1 %v710_v43 }
 0x28c   : > { %v1868_v17 = vpop.f32.mrb[35].mxu1  ;;  %3045 = vmatprep.subr.bf16.mxu1 %v856_v9 }
 0x28e   : > { %3005 = vmatpush1.bf16.msra.mxu0 %v4745_v35 }
 0x28f   : > { %3046 = vmatpush1.bf16.msra.mxu1 %v855_v46 }
 0x291   : > { %3300 = vmatmul.mubr.msk.bf16.vlgmr.msra.gmra.mrb[76].mxu0 %vm926_vm4, %v2972_v50 }
 0x292   : > { %3301 = vmatmul.mubr.msk.bf16.vlgmr.msra.gmra.mrb[76].mxu1 %vm926_vm4, %v2972_v50 }
 0x29c   : > { %v1932_v39 = vpop.f32.mrb[36].mxu0 }
 0x29d   : > { %v1980_v1 = vadd.f32 %v1932_v39, %v1870_v5  ;;  %v1934_v12 = vpop.f32.mrb[37].mxu0  ;;  %v1973_v57 = vpop.f32.mrb[36].mxu1 }
 0x29e   : > { %v1981_v40 = vadd.f32 %v1934_v12, %v1871_v53  ;;  %v1982_v44 = vadd.f32 %v1973_v57, %v1872_v16  ;;  %v1936_v61 = vpop.f32.mrb[38].mxu0  ;;  %v1975_v36 = vpop.f32.mrb[37].mxu1 }
 0x29f   : > { %v1984_v19 = vadd.f32 %v1980_v1, %v4740_v26  ;;  %v1983_v34 = vadd.f32 %v1975_v36, %v1873_v3  ;;  %v1937_v35 = vpop.f32.mrb[39].mxu0  ;;  %v1977_v58 = vpop.f32.mrb[38].mxu1 }
 0x2a0   : > { %v1985_v59 = vadd.f32 %v1981_v40, %v4740_v26  ;;  %v1986_v60 = vadd.f32 %v1982_v44, %v4740_v26  ;;  %v1978_v62 = vpop.f32.mrb[39].mxu1 }
 0x2a1   : > { %v1987_v63 = vadd.f32 %v1983_v34, %v4740_v26 }
 0x2a2   : > { %v3319_v15 = vpack.c.bf16 %v1985_v59, %v1984_v19 }
 0x2a3   : > { %v3320_v8 = vpack.c.bf16 %v1987_v63, %v1986_v60 }
 0x2a4   : > { %2004 = vst [vmem:[%s3802_s5 + $0x10] sm:$0xff] %v3319_v15 }
 0x2a5   : > { %2005 = vst [vmem:[%s3802_s5 + $0x18] sm:$0xff] %v3320_v8 }
 0x2b0   : > { %v2070_v25 = vpop.f32.mrb[40].mxu0 }
 0x2b1   : > { %v2072_v32 = vpop.f32.mrb[41].mxu0  ;;  %v2111_v21 = vpop.f32.mrb[40].mxu1 }
 0x2b2   : > { %v2074_v38 = vpop.f32.mrb[42].mxu0  ;;  %v2113_v37 = vpop.f32.mrb[41].mxu1 }
 0x2b3   : > { %v2075_v42 = vpop.f32.mrb[43].mxu0  ;;  %v2115_v18 = vpop.f32.mrb[42].mxu1 }
 0x2b4   : > { %v2116_v22 = vpop.f32.mrb[43].mxu1 }
 0x2c4   : > { %v2155_v24 = vpop.f32.mrb[44].mxu0 }
 0x2c5   : > { %v2156_v30 = vadd.f32 %v2155_v24, %v2070_v25  ;;  %v2157_v43 = vpop.f32.mrb[45].mxu0  ;;  %v2196_v47 = vpop.f32.mrb[44].mxu1 }
 0x2c6   : > { %v2158_v28 = vadd.f32 %v2157_v43, %v2072_v32  ;;  %v2197_v56 = vadd.f32 %v2196_v47, %v2111_v21  ;;  %v2159_v45 = vpop.f32.mrb[46].mxu0  ;;  %v2198_v10 = vpop.f32.mrb[45].mxu1 }
 0x2c7   : > { %v2199_v49 = vadd.f32 %v2198_v10, %v2113_v37  ;;  %v2160_v52 = vpop.f32.mrb[47].mxu0  ;;  %v2200_v48 = vpop.f32.mrb[46].mxu1 }
 0x2c8   : > { %v2201_v54 = vpop.f32.mrb[47].mxu1 }
 0x2d8   : > { %v2261_v51 = vpop.f32.mrb[48].mxu0 }
 0x2d9   : > { %v2309_v0 = vadd.f32 %v2261_v51, %v2156_v30  ;;  %v2263_v31 = vpop.f32.mrb[49].mxu0  ;;  %v2302_v46 = vpop.f32.mrb[48].mxu1 }
 0x2da   : > { %v2310_v55 = vadd.f32 %v2263_v31, %v2158_v28  ;;  %v2311_v2 = vadd.f32 %v2302_v46, %v2197_v56  ;;  %v2265_v13 = vpop.f32.mrb[50].mxu0  ;;  %v2304_v27 = vpop.f32.mrb[49].mxu1 }
 0x2db   : > { %v2312_v29 = vadd.f32 %v2304_v27, %v2199_v49  ;;  %v2266_v20 = vpop.f32.mrb[51].mxu0  ;;  %v2306_v4 = vpop.f32.mrb[50].mxu1 }
 0x2dc   : > { %v2307_v14 = vpop.f32.mrb[51].mxu1 }
 0x2ec   : > { %v2371_v5 = vpop.f32.mrb[52].mxu0 }
 0x2ed   : > { %v2419_v6 = vadd.f32 %v2371_v5, %v2309_v0  ;;  %v2373_v7 = vpop.f32.mrb[53].mxu0  ;;  %v2412_v53 = vpop.f32.mrb[52].mxu1 }
 0x2ee   : > { %v2420_v16 = vadd.f32 %v2373_v7, %v2310_v55  ;;  %v2421_v23 = vadd.f32 %v2412_v53, %v2311_v2  ;;  %v2375_v41 = vpop.f32.mrb[54].mxu0  ;;  %v2414_v3 = vpop.f32.mrb[53].mxu1 }
 0x2ef   : > { %v2422_v33 = vadd.f32 %v2414_v3, %v2312_v29  ;;  %v2376_v11 = vpop.f32.mrb[55].mxu0  ;;  %v2416_v9 = vpop.f32.mrb[54].mxu1 }
 0x2f0   : > { %v2417_v17 = vpop.f32.mrb[55].mxu1 }
 0x300   : > { %v2481_v50 = vpop.f32.mrb[56].mxu0 }
 0x301   : > { %v2529_v39 = vadd.f32 %v2481_v50, %v2419_v6  ;;  %v2483_v1 = vpop.f32.mrb[57].mxu0  ;;  %v2522_v12 = vpop.f32.mrb[56].mxu1 }
 0x302   : > { %v2530_v57 = vadd.f32 %v2483_v1, %v2420_v16  ;;  %v2531_v40 = vadd.f32 %v2522_v12, %v2421_v23  ;;  %v2485_v44 = vpop.f32.mrb[58].mxu0  ;;  %v2524_v61 = vpop.f32.mrb[57].mxu1 }
 0x303   : > { %v2533_v36 = vadd.f32 %v2529_v39, %v4740_v26  ;;  %v2532_v19 = vadd.f32 %v2524_v61, %v2422_v33  ;;  %v2486_v34 = vpop.f32.mrb[59].mxu0  ;;  %v2526_v35 = vpop.f32.mrb[58].mxu1 }
 0x304   : > { %v2534_v58 = vadd.f32 %v2530_v57, %v4740_v26  ;;  %v2535_v59 = vadd.f32 %v2531_v40, %v4740_v26  ;;  %v2527_v60 = vpop.f32.mrb[59].mxu1 }
 0x305   : > { %v2536_v62 = vadd.f32 %v2532_v19, %v4740_v26 }
 0x306   : > { %v3321_v63 = vpack.c.bf16 %v2534_v58, %v2533_v36 }
 0x307   : > { %v3322_v15 = vpack.c.bf16 %v2536_v62, %v2535_v59 }
 0x308   : > { %2553 = vst [vmem:[%s3802_s5 + $0x20] sm:$0xff] %v3321_v63 }
 0x309   : > { %2554 = vst [vmem:[%s3802_s5 + $0x28] sm:$0xff] %v3322_v15 }
 0x314   : > { %v2619_v8 = vpop.f32.mrb[60].mxu0 }
 0x315   : > { %v2621_v25 = vpop.f32.mrb[61].mxu0  ;;  %v2660_v32 = vpop.f32.mrb[60].mxu1 }
 0x316   : > { %v2623_v21 = vpop.f32.mrb[62].mxu0  ;;  %v2662_v38 = vpop.f32.mrb[61].mxu1 }
 0x317   : > { %v2624_v37 = vpop.f32.mrb[63].mxu0  ;;  %v2664_v42 = vpop.f32.mrb[62].mxu1 }
 0x318   : > { %v2665_v18 = vpop.f32.mrb[63].mxu1 }
 0x328   : > { %v2704_v22 = vpop.f32.mrb[64].mxu0 }
 0x329   : > { %v2705_v24 = vadd.f32 %v2704_v22, %v2619_v8  ;;  %v2706_v30 = vpop.f32.mrb[65].mxu0  ;;  %v2745_v43 = vpop.f32.mrb[64].mxu1 }
 0x32a   : > { %v2707_v47 = vadd.f32 %v2706_v30, %v2621_v25  ;;  %v2746_v28 = vadd.f32 %v2745_v43, %v2660_v32  ;;  %v2708_v56 = vpop.f32.mrb[66].mxu0  ;;  %v2747_v45 = vpop.f32.mrb[65].mxu1 }
 0x32b   : > { %v2748_v10 = vadd.f32 %v2747_v45, %v2662_v38  ;;  %v2709_v49 = vpop.f32.mrb[67].mxu0  ;;  %v2749_v52 = vpop.f32.mrb[66].mxu1 }
 0x32c   : > { %v2750_v48 = vpop.f32.mrb[67].mxu1 }
 0x33c   : > { %v2810_v54 = vpop.f32.mrb[68].mxu0 }
 0x33d   : > { %v2858_v51 = vadd.f32 %v2810_v54, %v2705_v24  ;;  %v2812_v0 = vpop.f32.mrb[69].mxu0  ;;  %v2851_v31 = vpop.f32.mrb[68].mxu1 }
 0x33e   : > { %v2859_v46 = vadd.f32 %v2812_v0, %v2707_v47  ;;  %v2860_v55 = vadd.f32 %v2851_v31, %v2746_v28  ;;  %v2814_v2 = vpop.f32.mrb[70].mxu0  ;;  %v2853_v13 = vpop.f32.mrb[69].mxu1 }
 0x33f   : > { %v2861_v27 = vadd.f32 %v2853_v13, %v2748_v10  ;;  %v2815_v29 = vpop.f32.mrb[71].mxu0  ;;  %v2855_v20 = vpop.f32.mrb[70].mxu1 }
 0x340   : > { %v2856_v4 = vpop.f32.mrb[71].mxu1 }
 0x350   : > { %v2920_v14 = vpop.f32.mrb[72].mxu0 }
 0x351   : > { %v2968_v5 = vadd.f32 %v2920_v14, %v2858_v51  ;;  %v2922_v6 = vpop.f32.mrb[73].mxu0  ;;  %v2961_v7 = vpop.f32.mrb[72].mxu1 }
 0x352   : > { %v2969_v53 = vadd.f32 %v2922_v6, %v2859_v46  ;;  %v2970_v16 = vadd.f32 %v2961_v7, %v2860_v55  ;;  %v2924_v23 = vpop.f32.mrb[74].mxu0  ;;  %v2963_v41 = vpop.f32.mrb[73].mxu1 }
 0x353   : > { %v2971_v3 = vadd.f32 %v2963_v41, %v2861_v27  ;;  %v2925_v33 = vpop.f32.mrb[75].mxu0  ;;  %v2965_v11 = vpop.f32.mrb[74].mxu1 }
 0x354   : > { %v2966_v9 = vpop.f32.mrb[75].mxu1 }
 0x364   : > { %v3030_v17 = vpop.f32.mrb[76].mxu0 }
 0x365   : > { %v3078_v50 = vadd.f32 %v3030_v17, %v2968_v5  ;;  %v3032_v39 = vpop.f32.mrb[77].mxu0  ;;  %v3071_v1 = vpop.f32.mrb[76].mxu1 }
 0x366   : > { %v3079_v12 = vadd.f32 %v3032_v39, %v2969_v53  ;;  %v3080_v57 = vadd.f32 %v3071_v1, %v2970_v16  ;;  %v3034_v40 = vpop.f32.mrb[78].mxu0  ;;  %v3073_v44 = vpop.f32.mrb[77].mxu1 }
 0x367   : > { %v3082_v61 = vadd.f32 %v3078_v50, %v4740_v26  ;;  %v3081_v36 = vadd.f32 %v3073_v44, %v2971_v3  ;;  %v3035_v19 = vpop.f32.mrb[79].mxu0  ;;  %v3075_v34 = vpop.f32.mrb[78].mxu1 }
 0x368   : > { %v3083_v35 = vadd.f32 %v3079_v12, %v4740_v26  ;;  %v3084_v58 = vadd.f32 %v3080_v57, %v4740_v26  ;;  %v3076_v59 = vpop.f32.mrb[79].mxu1 }
 0x369   : > { %v3085_v60 = vadd.f32 %v3081_v36, %v4740_v26 }
 0x36a   : > { %v3323_v62 = vpack.c.bf16 %v3083_v35, %v3082_v61 }
 0x36b   : > { %v3324_v63 = vpack.c.bf16 %v3085_v60, %v3084_v58 }
 0x36c   : > { %3102 = vst [vmem:[%s3802_s5 + $0x30] sm:$0xff] %v3323_v62 }
 0x36d   : > { %3103 = vst [vmem:[%s3802_s5 + $0x38] sm:$0xff] %v3324_v63 }
 0x36e   : > { %3515 = shalt.err (!%p3512_p0)
}
 0x36f   : > { %s3516_s5 = scalar_lea.hbm %s4900_s20, 1024  ;;  %s3520_s24 = scalar_lea.hbm %s4966_s3, 8192 }
 0x370   : > { %p3517_p2 = scmp.ne.s32.totalorder %s4900_s20, %s3516_s5  ;;  %p3521_p8 = scmp.lt.u32.totalorder %s4900_s20, %s4966_s3 }
 0x371   : > { %p3522_p11 = scmp.lt.u32.totalorder %s3520_s24, %s3516_s5  ;;  %p3524_p1 = scmp.lt.u32.totalorder %s3516_s5, %s4900_s20 }
 0x372   : > { %p3518_p4 = pnand %p3517_p2, %p4998_p3 }
 0x373   : > { %p3523_p13 = por %p3522_p11, %p3521_p8 }
 0x374   : > { %p3519_p6 = pneg %p3518_p4 }
 0x375   : > { %p3525_p5 = por %p3524_p1, %p3523_p13 }
 0x377   : > { %p3526_p7 = pnand %p3525_p5, %p3519_p6 }
 0x379   : > { %3529 = shalt.err (!%p3526_p7)
}
 0x37a   : > { %3347 = dma.vmem_to_hbm [thread:$0]  (%p4998_p3), %s4902_s8, 1024, %s4900_s20, %s3105_s22  }
 0x37b PF: > { %p3361_p9 = scmp.ge.s32.totalorder %s3618_s21, 2  ;;  %s3135_s27 = sand.u32 1, %s3582_s12  }
 0x37c   : > { %p4999_p10 = scmp.ne.s32.totalorder %s4986_s7, 0  ;;  %s3136_s25 = scalar_lea.sflag [#allocation7], %s3135_s27 }
 0x37e   : > { %p3354_p12 = pnand %p3361_p9, %p4999_p10 }
 0x380   : > { %3577 = dma.done.wait (!%p3354_p12), %s3136_s25, 1024  }
 0x381   : > { %3579 = vsyncadd (!%p3354_p12), %s3136_s25, 4294966272  ;;  %s17_s21 = sadd.s32 1, %s3618_s21   ;;  %s5000_s15 = sld [smem:[#allocation18_spill]] }
 0x382   : > { %p14_p0 = scmp.ge.s32.totalorder %s17_s21, 10   ;;  %s5001_s16 = sld [smem:[#allocation19_spill]] }
 0x383   : > { %s5002_s17 = sld [smem:[#allocation20_spill]]  ;;  %s5003_s18 = sld [smem:[#allocation21_spill]] }
 0x384   : > { %s5004_s19 = sld [smem:[#allocation22_spill]]  ;;  %s5005_s20 = sld [smem:[#allocation23_spill]] }
 0x385   : > { %s5006_s12 = smov %s3586_s13  ;;  %s5007_s13 = smov %s3590_s14 }
 0x386   : > { %s5008_s14 = smov %s3762_s23  ;;  %16 = sbr.rel (!%p14_p0) target bundleno = 9 (0x9), region = 94 }
 0x38d   :  { %3141 = vsyncpa [#allocation6], 1 }
 0x38e   :  { %3143 = vsyncpa [#allocation6 + $0x1], 1 }
 0x38f   :  { %3144 = vsyncpa [#allocation7], 1 }
 0x390   :  { %3146 = vsyncpa [#allocation7 + $0x1], 1 }
 0x391   :  { %3147 = vsyncmov [#allocation4] }
 0x394   :  { %s3148_s4 = vpop.sfrf %3147 }
 0x395   :  { %p3311_p3 = scmp.ne.s32.totalorder %s3148_s4, 0 }
 0x397   :  { %3152 = shalt.err (%p3311_p3)  }
 0x398   :  { %3154 = vsyncmov [#allocation4 + $0x1] }
 0x39b   :  { %s3155_s7 = vpop.sfrf %3154 }
 0x39c   :  { %p3312_p2 = scmp.ne.s32.totalorder %s3155_s7, 0 }
 0x39e   :  { %3159 = shalt.err (%p3312_p2)  }

</bundles_post_ra>
